<compile_context>
chip_gen: v5e
topology: v5e:2x2
jax: 0.10.0
libtpu: 0.0.40
codegen_flags: <defaults>
</compile_context>

<pallas_src>
import functools

import jax
import jax.numpy as jnp
from jax.experimental import pallas as pl
from jax.experimental.pallas import tpu as pltpu


def _erf(x):
    # Abramowitz & Stegun 7.1.26 rational approximation (max abs err ~1.5e-7).
    # Avoids relying on an erf lowering inside Mosaic; only exp/mul/add used.
    p = 0.3275911
    a1, a2, a3, a4, a5 = (0.254829592, -0.284496736, 1.421413741,
                          -1.453152027, 1.061405429)
    s = jnp.where(x >= 0.0, 1.0, -1.0)
    ax = jnp.abs(x)
    t = 1.0 / (1.0 + p * ax)
    poly = t * (a1 + t * (a2 + t * (a3 + t * (a4 + t * a5))))
    return s * (1.0 - poly * jnp.exp(-ax * ax))


def _gelu_exact(x):
    # Matches torch.nn.GELU() (erf-based, not tanh approximation).
    return 0.5 * x * (1.0 + _erf(x * (2.0 ** -0.5)))


def cross_block_kernel(x0_ref, x1_ref,
                       wqk_ref, bqk_ref, wv_ref, bv_ref, wo_ref, bo_ref,
                       w1x_ref, w1m_ref, b1_ref, ln_g_ref, ln_b_ref,
                       w2_ref, b2_ref,
                       out0_ref, out1_ref,
                       *, num_heads):
    f32 = jnp.float32
    bf16 = jnp.bfloat16

    x0 = x0_ref[0].astype(f32)          # (N0, D)
    x1 = x1_ref[0].astype(f32)          # (N1, D)
    x0b = x0.astype(bf16)               # bf16 copies for MXU operands
    x1b = x1.astype(bf16)

    N0, D = x0.shape
    N1 = x1.shape[0]
    H = num_heads

    bo = bo_ref[...]                    # (1, D) f32

    # fp32 accumulators for the already-output-projected messages.
    m0 = jnp.zeros((N0, D), f32)
    m1 = jnp.zeros((N1, D), f32)

    dn_last = (((1,), (1,)), ((), ()))   # contract last dims:  (N0,dh)x(N1,dh) -> (N0,N1)
    dn_first = (((0,), (0,)), ((), ()))  # contract first dims: (N0,N1)x(N0,dh) -> (N1,dh)

    # Static unroll over heads (H is small); per-head intermediates are dead
    # after each iteration because they only feed the fp32 accumulators.
    for h in range(H):
        wqk_h = wqk_ref[h]               # (D, dh) bf16, sqrt(scale) pre-folded
        bqk_h = bqk_ref[h]               # (1, dh) f32,  sqrt(scale) pre-folded
        wv_h = wv_ref[h]                 # (D, dh) bf16
        bv_h = bv_ref[h]                 # (1, dh) f32
        wo_h = wo_ref[h]                 # (dh, D) bf16

        q0 = (jnp.dot(x0b, wqk_h, preferred_element_type=f32) + bqk_h).astype(bf16)
        q1 = (jnp.dot(x1b, wqk_h, preferred_element_type=f32) + bqk_h).astype(bf16)
        v0 = (jnp.dot(x0b, wv_h, preferred_element_type=f32) + bv_h).astype(bf16)
        v1 = (jnp.dot(x1b, wv_h, preferred_element_type=f32) + bv_h).astype(bf16)

        # Single score matrix per head, reused for both attention directions.
        sim = jax.lax.dot_general(q0, q1, dn_last,
                                  preferred_element_type=f32)      # (N0, N1)

        # 0 -> 1: softmax over N1 (lanes).
        p01 = jnp.exp(sim - jnp.max(sim, axis=-1, keepdims=True))
        p01 = p01 * pl.reciprocal(jnp.sum(p01, axis=-1, keepdims=True),
                                  approx=True)
        # 1 -> 0: softmax over N0 (sublanes) of the SAME score matrix.
        p10 = jnp.exp(sim - jnp.max(sim, axis=0, keepdims=True))
        p10 = p10 * pl.reciprocal(jnp.sum(p10, axis=0, keepdims=True),
                                  approx=True)

        m0h = jnp.dot(p01.astype(bf16), v1,
                      preferred_element_type=f32)                  # (N0, dh)
        m1h = jax.lax.dot_general(p10.astype(bf16), v0, dn_first,
                                  preferred_element_type=f32)      # (N1, dh)

        # Fold the head-concat into the output projection: m @ Wo = sum_h m_h @ Wo_h.
        m0 = m0 + jnp.dot(m0h.astype(bf16), wo_h, preferred_element_type=f32)
        m1 = m1 + jnp.dot(m1h.astype(bf16), wo_h, preferred_element_type=f32)

    m0 = m0 + bo
    m1 = m1 + bo

    w1x = w1x_ref[...]                  # (D, 2D) bf16
    w1m = w1m_ref[...]                  # (D, 2D) bf16
    b1 = b1_ref[...]                    # (1, 2D) f32
    ln_g = ln_g_ref[...]                # (1, 2D) f32
    ln_b = ln_b_ref[...]                # (1, 2D) f32
    w2 = w2_ref[...]                    # (2D, D) bf16
    b2 = b2_ref[...]                    # (1, D)  f32

    def ffn_residual(x, xb, m):
        # concat([x, m]) @ W1 == x @ W1_x + m @ W1_m  (no lane-dim concat).
        y = (jnp.dot(xb, w1x, preferred_element_type=f32)
             + jnp.dot(m.astype(bf16), w1m, preferred_element_type=f32)
             + b1)
        mu = jnp.mean(y, axis=-1, keepdims=True)
        yc = y - mu
        var = jnp.mean(yc * yc, axis=-1, keepdims=True)
        y = yc * jax.lax.rsqrt(var + 1e-5)           # LayerNorm, eps=1e-5
        y = y * ln_g + ln_b
        y = _gelu_exact(y)
        y = jnp.dot(y.astype(bf16), w2, preferred_element_type=f32) + b2
        return x + y

    out0_ref[0] = ffn_residual(x0, x0b, m0).astype(out0_ref.dtype)
    out1_ref[0] = ffn_residual(x1, x1b, m1).astype(out1_ref.dtype)


def cross_block_pallas(x0, x1, params, num_heads):
    B, N0, D = x0.shape
    _, N1, _ = x1.shape
    H = num_heads
    dh = D // H
    scale_sqrt = (dh ** -0.5) ** 0.5

    f32 = jnp.float32
    bf16 = jnp.bfloat16

    # Weight prep (done once in the wrapper, O(D^2)):
    #  - pre-transpose Linear weights to (in, out),
    #  - head-major layout for qk / v / out projections,
    #  - fold sqrt(scale) into W_qk / b_qk,
    #  - split W1 so the FFN concat disappears,
    #  - bf16 weights for MXU operands, fp32 biases / LN params.
    wqk = (params["wqk"].T * scale_sqrt).reshape(D, H, dh).transpose(1, 0, 2).astype(bf16)  # (H, D, dh)
    bqk = (params["bqk"] * scale_sqrt).reshape(H, 1, dh).astype(f32)                        # (H, 1, dh)
    wv = params["wv"].T.reshape(D, H, dh).transpose(1, 0, 2).astype(bf16)                   # (H, D, dh)
    bv = params["bv"].reshape(H, 1, dh).astype(f32)                                         # (H, 1, dh)
    wo = params["wo"].T.reshape(H, dh, D).astype(bf16)                                      # (H, dh, D)
    bo = params["bo"][None, :].astype(f32)                                                  # (1, D)
    w1t = params["w1"].T                                                                    # (2D, 2D) in->out
    w1x = w1t[:D].astype(bf16)                                                              # (D, 2D)
    w1m = w1t[D:].astype(bf16)                                                              # (D, 2D)
    b1 = params["b1"][None, :].astype(f32)                                                  # (1, 2D)
    ln_g = params["ln_g"][None, :].astype(f32)
    ln_b = params["ln_b"][None, :].astype(f32)
    w2 = params["w2"].T.astype(bf16)                                                        # (2D, D)
    b2 = params["b2"][None, :].astype(f32)                                                  # (1, D)

    consts = [wqk, bqk, wv, bv, wo, bo, w1x, w1m, b1, ln_g, ln_b, w2, b2]

    def const_spec(c):
        zeros = (0,) * c.ndim
        return pl.BlockSpec(c.shape, lambda b, zeros=zeros: zeros)

    const_specs = [const_spec(c) for c in consts]

    kernel = functools.partial(cross_block_kernel, num_heads=num_heads)
    out0, out1 = pl.pallas_call(
        kernel,
        out_shape=(jax.ShapeDtypeStruct((B, N0, D), x0.dtype),
                   jax.ShapeDtypeStruct((B, N1, D), x1.dtype)),
        grid_spec=pltpu.PrefetchScalarGridSpec(
            num_scalar_prefetch=0,
            grid=(B,),
            in_specs=[pl.BlockSpec((1, N0, D), lambda b: (b, 0, 0)),
                      pl.BlockSpec((1, N1, D), lambda b: (b, 0, 0))] + const_specs,
            out_specs=[pl.BlockSpec((1, N0, D), lambda b: (b, 0, 0)),
                       pl.BlockSpec((1, N1, D), lambda b: (b, 0, 0))],
        ),
        compiler_params=pltpu.CompilerParams(
            dimension_semantics=("parallel",),
            vmem_limit_bytes=32 * 1024 * 1024),
    )(x0, x1, *consts)
    return out0, out1


def cross_block_ref(x0, x1, params, num_heads):
    """Pure-JAX (fp32) mirror of the PyTorch forward (mask=None, non-flash path)."""
    D = x0.shape[-1]
    dh = D // num_heads
    scale = dh ** -0.5

    def lin(x, w, b):
        return x @ w.T + b

    def split_heads(t):
        B, N, _ = t.shape
        return t.reshape(B, N, num_heads, dh).transpose(0, 2, 1, 3)

    qk0 = split_heads(lin(x0, params["wqk"], params["bqk"])) * scale ** 0.5
    qk1 = split_heads(lin(x1, params["wqk"], params["bqk"])) * scale ** 0.5
    v0 = split_heads(lin(x0, params["wv"], params["bv"]))
    v1 = split_heads(lin(x1, params["wv"], params["bv"]))
    sim = jnp.einsum("bhid,bhjd->bhij", qk0, qk1)
    attn01 = jax.nn.softmax(sim, axis=-1)
    attn10 = jax.nn.softmax(jnp.swapaxes(sim, -1, -2), axis=-1)
    m0 = jnp.einsum("bhij,bhjd->bhid", attn01, v1)
    m1 = jnp.einsum("bhij,bhjd->bhid", attn10, v0)

    def merge_heads(t):
        B, H, N, d = t.shape
        return t.transpose(0, 2, 1, 3).reshape(B, N, H * d)

    m0 = lin(merge_heads(m0), params["wo"], params["bo"])
    m1 = lin(merge_heads(m1), params["wo"], params["bo"])

    def ffn(x, m):
        y = jnp.concatenate([x, m], axis=-1)
        y = lin(y, params["w1"], params["b1"])
        mu = y.mean(-1, keepdims=True)
        var = ((y - mu) ** 2).mean(-1, keepdims=True)
        y = (y - mu) / jnp.sqrt(var + 1e-5)
        y = y * params["ln_g"] + params["ln_b"]
        y = 0.5 * y * (1.0 + jax.scipy.special.erf(y / jnp.sqrt(2.0)))
        y = lin(y, params["w2"], params["b2"])
        return x + y

    return ffn(x0, m0), ffn(x1, m1)


if __name__ == "__main__":
    B, N, D, H = 2, 8, 32, 4            # embed_dim=32, num_heads=4, seq=8
    key = jax.random.PRNGKey(0)
    keys = jax.random.split(key, 12)
    x0 = jax.random.normal(keys[0], (B, N, D), jnp.float32)
    x1 = jax.random.normal(keys[1], (B, N, D), jnp.float32)

    def w(k, shape, s=0.2):
        return jax.random.normal(k, shape, jnp.float32) * s

    params = dict(
        wqk=w(keys[2], (D, D)),  bqk=w(keys[3], (D,)),
        wv=w(keys[4], (D, D)),   bv=w(keys[5], (D,)),
        wo=w(keys[6], (D, D)),   bo=w(keys[7], (D,)),
        w1=w(keys[8], (2 * D, 2 * D)), b1=w(keys[9], (2 * D,)),
        ln_g=jnp.ones((2 * D,), jnp.float32),
        ln_b=jnp.zeros((2 * D,), jnp.float32),
        w2=w(keys[10], (D, 2 * D)), b2=w(keys[11], (D,)),
    )

    out0, out1 = cross_block_pallas(x0, x1, params, H)
    jax.block_until_ready((out0, out1))

    r0, r1 = cross_block_ref(x0, x1, params, H)
    # Kernel uses bf16 MXU operands (fp32 accumulation); compare against the
    # fp32 reference with a bf16-appropriate tolerance.
    assert jnp.allclose(out0, r0, rtol=5e-2, atol=5e-2), "out0 mismatch"
    assert jnp.allclose(out1, r1, rtol=5e-2, atol=5e-2), "out1 mismatch"
    print("KERNEL_OK")
</pallas_src>

<mosaic_0001>
module attributes {stable_mosaic.version = 11 : i64} {
  func.func @cross_block_kernel(%arg0: i32, %arg1: memref<1x8x32xf32, #tpu.memory_space<vmem>>, %arg2: memref<1x8x32xf32, #tpu.memory_space<vmem>>, %arg3: memref<4x32x8xbf16, #tpu.memory_space<vmem>>, %arg4: memref<4x1x8xf32, #tpu.memory_space<vmem>>, %arg5: memref<4x32x8xbf16, #tpu.memory_space<vmem>>, %arg6: memref<4x1x8xf32, #tpu.memory_space<vmem>>, %arg7: memref<4x8x32xbf16, #tpu.memory_space<vmem>>, %arg8: memref<1x32xf32, #tpu.memory_space<vmem>>, %arg9: memref<32x64xbf16, #tpu.memory_space<vmem>>, %arg10: memref<32x64xbf16, #tpu.memory_space<vmem>>, %arg11: memref<1x64xf32, #tpu.memory_space<vmem>>, %arg12: memref<1x64xf32, #tpu.memory_space<vmem>>, %arg13: memref<1x64xf32, #tpu.memory_space<vmem>>, %arg14: memref<64x32xbf16, #tpu.memory_space<vmem>>, %arg15: memref<1x32xf32, #tpu.memory_space<vmem>>, %arg16: memref<1x8x32xf32, #tpu.memory_space<vmem>>, %arg17: memref<1x8x32xf32, #tpu.memory_space<vmem>>) attributes {dimension_semantics = [#tpu.dimension_semantics<parallel>], iteration_bounds = array<i64: 2>, scalar_prefetch = 0 : i64, scratch_operands = 0 : i64, tpu.core_type = #tpu.core_type<tc>, window_params = [{transform_indices = @transform_0, window_bounds = array<i64: 1, 8, 32>}, {transform_indices = @transform_1, window_bounds = array<i64: 1, 8, 32>}, {pipeline_mode = #tpu.pipeline_mode<synchronous>, transform_indices = @transform_2, window_bounds = array<i64: 4, 32, 8>}, {pipeline_mode = #tpu.pipeline_mode<synchronous>, transform_indices = @transform_3, window_bounds = array<i64: 4, 1, 8>}, {pipeline_mode = #tpu.pipeline_mode<synchronous>, transform_indices = @transform_4, window_bounds = array<i64: 4, 32, 8>}, {pipeline_mode = #tpu.pipeline_mode<synchronous>, transform_indices = @transform_5, window_bounds = array<i64: 4, 1, 8>}, {pipeline_mode = #tpu.pipeline_mode<synchronous>, transform_indices = @transform_6, window_bounds = array<i64: 4, 8, 32>}, {pipeline_mode = #tpu.pipeline_mode<synchronous>, transform_indices = @transform_7, window_bounds = array<i64: 1, 32>}, {pipeline_mode = #tpu.pipeline_mode<synchronous>, transform_indices = @transform_8, window_bounds = array<i64: 32, 64>}, {pipeline_mode = #tpu.pipeline_mode<synchronous>, transform_indices = @transform_9, window_bounds = array<i64: 32, 64>}, {pipeline_mode = #tpu.pipeline_mode<synchronous>, transform_indices = @transform_10, window_bounds = array<i64: 1, 64>}, {pipeline_mode = #tpu.pipeline_mode<synchronous>, transform_indices = @transform_11, window_bounds = array<i64: 1, 64>}, {pipeline_mode = #tpu.pipeline_mode<synchronous>, transform_indices = @transform_12, window_bounds = array<i64: 1, 64>}, {pipeline_mode = #tpu.pipeline_mode<synchronous>, transform_indices = @transform_13, window_bounds = array<i64: 64, 32>}, {pipeline_mode = #tpu.pipeline_mode<synchronous>, transform_indices = @transform_14, window_bounds = array<i64: 1, 32>}, {transform_indices = @transform_15, window_bounds = array<i64: 1, 8, 32>}, {transform_indices = @transform_16, window_bounds = array<i64: 1, 8, 32>}]} {
    %c0 = arith.constant 0 : index
    %c0_0 = arith.constant 0 : index
    %c0_1 = arith.constant 0 : index
    %0 = vector.load %arg1[%c0, %c0_0, %c0_1] : memref<1x8x32xf32, #tpu.memory_space<vmem>>, vector<1x8x32xf32>
    %1 = vector.shape_cast %0 : vector<1x8x32xf32> to vector<8x32xf32>
    %c0_2 = arith.constant 0 : index
    %c0_3 = arith.constant 0 : index
    %c0_4 = arith.constant 0 : index
    %2 = vector.load %arg2[%c0_2, %c0_3, %c0_4] : memref<1x8x32xf32, #tpu.memory_space<vmem>>, vector<1x8x32xf32>
    %3 = vector.shape_cast %2 : vector<1x8x32xf32> to vector<8x32xf32>
    %4 = arith.truncf %1 : vector<8x32xf32> to vector<8x32xbf16>
    %5 = arith.truncf %3 : vector<8x32xf32> to vector<8x32xbf16>
    %c0_5 = arith.constant 0 : index
    %c0_6 = arith.constant 0 : index
    %6 = vector.load %arg8[%c0_5, %c0_6] : memref<1x32xf32, #tpu.memory_space<vmem>>, vector<1x32xf32>
    %cst = arith.constant 0.000000e+00 : f32
    %7 = vector.broadcast %cst : f32 to vector<8x32xf32>
    %cst_7 = arith.constant 0.000000e+00 : f32
    %8 = vector.broadcast %cst_7 : f32 to vector<8x32xf32>
    %c0_8 = arith.constant 0 : index
    %c0_9 = arith.constant 0 : index
    %c0_10 = arith.constant 0 : index
    %9 = vector.load %arg3[%c0_8, %c0_9, %c0_10] : memref<4x32x8xbf16, #tpu.memory_space<vmem>>, vector<1x32x8xbf16>
    %10 = vector.shape_cast %9 : vector<1x32x8xbf16> to vector<32x8xbf16>
    %c0_11 = arith.constant 0 : index
    %c0_12 = arith.constant 0 : index
    %c0_13 = arith.constant 0 : index
    %11 = vector.load %arg4[%c0_11, %c0_12, %c0_13] : memref<4x1x8xf32, #tpu.memory_space<vmem>>, vector<1x1x8xf32>
    %12 = vector.shape_cast %11 : vector<1x1x8xf32> to vector<1x8xf32>
    %c0_14 = arith.constant 0 : index
    %c0_15 = arith.constant 0 : index
    %c0_16 = arith.constant 0 : index
    %13 = vector.load %arg5[%c0_14, %c0_15, %c0_16] : memref<4x32x8xbf16, #tpu.memory_space<vmem>>, vector<1x32x8xbf16>
    %14 = vector.shape_cast %13 : vector<1x32x8xbf16> to vector<32x8xbf16>
    %c0_17 = arith.constant 0 : index
    %c0_18 = arith.constant 0 : index
    %c0_19 = arith.constant 0 : index
    %15 = vector.load %arg6[%c0_17, %c0_18, %c0_19] : memref<4x1x8xf32, #tpu.memory_space<vmem>>, vector<1x1x8xf32>
    %16 = vector.shape_cast %15 : vector<1x1x8xf32> to vector<1x8xf32>
    %c0_20 = arith.constant 0 : index
    %c0_21 = arith.constant 0 : index
    %c0_22 = arith.constant 0 : index
    %17 = vector.load %arg7[%c0_20, %c0_21, %c0_22] : memref<4x8x32xbf16, #tpu.memory_space<vmem>>, vector<1x8x32xbf16>
    %18 = vector.shape_cast %17 : vector<1x8x32xbf16> to vector<8x32xbf16>
    %cst_23 = arith.constant dense<0.000000e+00> : vector<8x8xf32>
    %19 = tpu.matmul %4, %10, %cst_23 {dimension_numbers = #tpu.dot_dimension_numbers<[1], [0], [0], [1], [0, 0, 1, 1], [], []>} : vector<8x32xbf16>, vector<32x8xbf16>, vector<8x8xf32> -> vector<8x8xf32>
    %20 = vector.broadcast %12 : vector<1x8xf32> to vector<8x8xf32>
    %21 = arith.addf %19, %20 : vector<8x8xf32>
    %22 = arith.truncf %21 : vector<8x8xf32> to vector<8x8xbf16>
    %cst_24 = arith.constant dense<0.000000e+00> : vector<8x8xf32>
    %23 = tpu.matmul %5, %10, %cst_24 {dimension_numbers = #tpu.dot_dimension_numbers<[1], [0], [0], [1], [0, 0, 1, 1], [], []>} : vector<8x32xbf16>, vector<32x8xbf16>, vector<8x8xf32> -> vector<8x8xf32>
    %24 = vector.broadcast %12 : vector<1x8xf32> to vector<8x8xf32>
    %25 = arith.addf %23, %24 : vector<8x8xf32>
    %26 = arith.truncf %25 : vector<8x8xf32> to vector<8x8xbf16>
    %cst_25 = arith.constant dense<0.000000e+00> : vector<8x8xf32>
    %27 = tpu.matmul %4, %14, %cst_25 {dimension_numbers = #tpu.dot_dimension_numbers<[1], [0], [0], [1], [0, 0, 1, 1], [], []>} : vector<8x32xbf16>, vector<32x8xbf16>, vector<8x8xf32> -> vector<8x8xf32>
    %28 = vector.broadcast %16 : vector<1x8xf32> to vector<8x8xf32>
    %29 = arith.addf %27, %28 : vector<8x8xf32>
    %30 = arith.truncf %29 : vector<8x8xf32> to vector<8x8xbf16>
    %cst_26 = arith.constant dense<0.000000e+00> : vector<8x8xf32>
    %31 = tpu.matmul %5, %14, %cst_26 {dimension_numbers = #tpu.dot_dimension_numbers<[1], [0], [0], [1], [0, 0, 1, 1], [], []>} : vector<8x32xbf16>, vector<32x8xbf16>, vector<8x8xf32> -> vector<8x8xf32>
    %32 = vector.broadcast %16 : vector<1x8xf32> to vector<8x8xf32>
    %33 = arith.addf %31, %32 : vector<8x8xf32>
    %34 = arith.truncf %33 : vector<8x8xf32> to vector<8x8xbf16>
    %cst_27 = arith.constant dense<0.000000e+00> : vector<8x8xf32>
    %35 = tpu.matmul %22, %26, %cst_27 {dimension_numbers = #tpu.dot_dimension_numbers<[1], [1], [0], [0], [0, 0, 1, 0], [], []>} : vector<8x8xbf16>, vector<8x8xbf16>, vector<8x8xf32> -> vector<8x8xf32>
    %cst_28 = arith.constant dense<0xFF800000> : vector<8xf32>
    %36 = vector.multi_reduction <maximumf>, %35, %cst_28 [1] : vector<8x8xf32> to vector<8xf32>
    %37 = vector.shape_cast %36 : vector<8xf32> to vector<8x1xf32>
    %38 = vector.broadcast %37 : vector<8x1xf32> to vector<8x8xf32>
    %39 = arith.subf %35, %38 : vector<8x8xf32>
    %40 = math.exp %39 : vector<8x8xf32>
    %cst_29 = arith.constant dense<0.000000e+00> : vector<8xf32>
    %41 = vector.multi_reduction <add>, %40, %cst_29 [1] : vector<8x8xf32> to vector<8xf32>
    %42 = vector.shape_cast %41 : vector<8xf32> to vector<8x1xf32>
    %43 = tpu.reciprocal %42 {approx = true} : vector<8x1xf32> -> vector<8x1xf32>
    %44 = vector.broadcast %43 : vector<8x1xf32> to vector<8x8xf32>
    %45 = arith.mulf %40, %44 : vector<8x8xf32>
    %cst_30 = arith.constant dense<0xFF800000> : vector<8xf32>
    %46 = vector.multi_reduction <maximumf>, %35, %cst_30 [0] : vector<8x8xf32> to vector<8xf32>
    %47 = vector.shape_cast %46 : vector<8xf32> to vector<1x8xf32>
    %48 = vector.broadcast %47 : vector<1x8xf32> to vector<8x8xf32>
    %49 = arith.subf %35, %48 : vector<8x8xf32>
    %50 = math.exp %49 : vector<8x8xf32>
    %cst_31 = arith.constant dense<0.000000e+00> : vector<8xf32>
    %51 = vector.multi_reduction <add>, %50, %cst_31 [0] : vector<8x8xf32> to vector<8xf32>
    %52 = vector.shape_cast %51 : vector<8xf32> to vector<1x8xf32>
    %53 = tpu.reciprocal %52 {approx = true} : vector<1x8xf32> -> vector<1x8xf32>
    %54 = vector.broadcast %53 : vector<1x8xf32> to vector<8x8xf32>
    %55 = arith.mulf %50, %54 : vector<8x8xf32>
    %56 = arith.truncf %45 : vector<8x8xf32> to vector<8x8xbf16>
    %cst_32 = arith.constant dense<0.000000e+00> : vector<8x8xf32>
    %57 = tpu.matmul %56, %34, %cst_32 {dimension_numbers = #tpu.dot_dimension_numbers<[1], [0], [0], [1], [0, 0, 1, 1], [], []>} : vector<8x8xbf16>, vector<8x8xbf16>, vector<8x8xf32> -> vector<8x8xf32>
    %58 = arith.truncf %55 : vector<8x8xf32> to vector<8x8xbf16>
    %cst_33 = arith.constant dense<0.000000e+00> : vector<8x8xf32>
    %59 = tpu.matmul %58, %30, %cst_33 {dimension_numbers = #tpu.dot_dimension_numbers<[0], [0], [1], [1], [0, 1, 1, 1], [], []>} : vector<8x8xbf16>, vector<8x8xbf16>, vector<8x8xf32> -> vector<8x8xf32>
    %60 = arith.truncf %57 : vector<8x8xf32> to vector<8x8xbf16>
    %cst_34 = arith.constant dense<0.000000e+00> : vector<8x32xf32>
    %61 = tpu.matmul %60, %18, %cst_34 {dimension_numbers = #tpu.dot_dimension_numbers<[1], [0], [0], [1], [0, 0, 1, 1], [], []>} : vector<8x8xbf16>, vector<8x32xbf16>, vector<8x32xf32> -> vector<8x32xf32>
    %62 = arith.addf %7, %61 : vector<8x32xf32>
    %63 = arith.truncf %59 : vector<8x8xf32> to vector<8x8xbf16>
    %cst_35 = arith.constant dense<0.000000e+00> : vector<8x32xf32>
    %64 = tpu.matmul %63, %18, %cst_35 {dimension_numbers = #tpu.dot_dimension_numbers<[1], [0], [0], [1], [0, 0, 1, 1], [], []>} : vector<8x8xbf16>, vector<8x32xbf16>, vector<8x32xf32> -> vector<8x32xf32>
    %65 = arith.addf %8, %64 : vector<8x32xf32>
    %c1 = arith.constant 1 : index
    %c0_36 = arith.constant 0 : index
    %c0_37 = arith.constant 0 : index
    %66 = vector.load %arg3[%c1, %c0_36, %c0_37] : memref<4x32x8xbf16, #tpu.memory_space<vmem>>, vector<1x32x8xbf16>
    %67 = vector.shape_cast %66 : vector<1x32x8xbf16> to vector<32x8xbf16>
    %c1_38 = arith.constant 1 : index
    %c0_39 = arith.constant 0 : index
    %c0_40 = arith.constant 0 : index
    %68 = vector.load %arg4[%c1_38, %c0_39, %c0_40] : memref<4x1x8xf32, #tpu.memory_space<vmem>>, vector<1x1x8xf32>
    %69 = vector.shape_cast %68 : vector<1x1x8xf32> to vector<1x8xf32>
    %c1_41 = arith.constant 1 : index
    %c0_42 = arith.constant 0 : index
    %c0_43 = arith.constant 0 : index
    %70 = vector.load %arg5[%c1_41, %c0_42, %c0_43] : memref<4x32x8xbf16, #tpu.memory_space<vmem>>, vector<1x32x8xbf16>
    %71 = vector.shape_cast %70 : vector<1x32x8xbf16> to vector<32x8xbf16>
    %c1_44 = arith.constant 1 : index
    %c0_45 = arith.constant 0 : index
    %c0_46 = arith.constant 0 : index
    %72 = vector.load %arg6[%c1_44, %c0_45, %c0_46] : memref<4x1x8xf32, #tpu.memory_space<vmem>>, vector<1x1x8xf32>
    %73 = vector.shape_cast %72 : vector<1x1x8xf32> to vector<1x8xf32>
    %c1_47 = arith.constant 1 : index
    %c0_48 = arith.constant 0 : index
    %c0_49 = arith.constant 0 : index
    %74 = vector.load %arg7[%c1_47, %c0_48, %c0_49] : memref<4x8x32xbf16, #tpu.memory_space<vmem>>, vector<1x8x32xbf16>
    %75 = vector.shape_cast %74 : vector<1x8x32xbf16> to vector<8x32xbf16>
    %cst_50 = arith.constant dense<0.000000e+00> : vector<8x8xf32>
    %76 = tpu.matmul %4, %67, %cst_50 {dimension_numbers = #tpu.dot_dimension_numbers<[1], [0], [0], [1], [0, 0, 1, 1], [], []>} : vector<8x32xbf16>, vector<32x8xbf16>, vector<8x8xf32> -> vector<8x8xf32>
    %77 = vector.broadcast %69 : vector<1x8xf32> to vector<8x8xf32>
    %78 = arith.addf %76, %77 : vector<8x8xf32>
    %79 = arith.truncf %78 : vector<8x8xf32> to vector<8x8xbf16>
    %cst_51 = arith.constant dense<0.000000e+00> : vector<8x8xf32>
    %80 = tpu.matmul %5, %67, %cst_51 {dimension_numbers = #tpu.dot_dimension_numbers<[1], [0], [0], [1], [0, 0, 1, 1], [], []>} : vector<8x32xbf16>, vector<32x8xbf16>, vector<8x8xf32> -> vector<8x8xf32>
    %81 = vector.broadcast %69 : vector<1x8xf32> to vector<8x8xf32>
    %82 = arith.addf %80, %81 : vector<8x8xf32>
    %83 = arith.truncf %82 : vector<8x8xf32> to vector<8x8xbf16>
    %cst_52 = arith.constant dense<0.000000e+00> : vector<8x8xf32>
    %84 = tpu.matmul %4, %71, %cst_52 {dimension_numbers = #tpu.dot_dimension_numbers<[1], [0], [0], [1], [0, 0, 1, 1], [], []>} : vector<8x32xbf16>, vector<32x8xbf16>, vector<8x8xf32> -> vector<8x8xf32>
    %85 = vector.broadcast %73 : vector<1x8xf32> to vector<8x8xf32>
    %86 = arith.addf %84, %85 : vector<8x8xf32>
    %87 = arith.truncf %86 : vector<8x8xf32> to vector<8x8xbf16>
    %cst_53 = arith.constant dense<0.000000e+00> : vector<8x8xf32>
    %88 = tpu.matmul %5, %71, %cst_53 {dimension_numbers = #tpu.dot_dimension_numbers<[1], [0], [0], [1], [0, 0, 1, 1], [], []>} : vector<8x32xbf16>, vector<32x8xbf16>, vector<8x8xf32> -> vector<8x8xf32>
    %89 = vector.broadcast %73 : vector<1x8xf32> to vector<8x8xf32>
    %90 = arith.addf %88, %89 : vector<8x8xf32>
    %91 = arith.truncf %90 : vector<8x8xf32> to vector<8x8xbf16>
    %cst_54 = arith.constant dense<0.000000e+00> : vector<8x8xf32>
    %92 = tpu.matmul %79, %83, %cst_54 {dimension_numbers = #tpu.dot_dimension_numbers<[1], [1], [0], [0], [0, 0, 1, 0], [], []>} : vector<8x8xbf16>, vector<8x8xbf16>, vector<8x8xf32> -> vector<8x8xf32>
    %cst_55 = arith.constant dense<0xFF800000> : vector<8xf32>
    %93 = vector.multi_reduction <maximumf>, %92, %cst_55 [1] : vector<8x8xf32> to vector<8xf32>
    %94 = vector.shape_cast %93 : vector<8xf32> to vector<8x1xf32>
    %95 = vector.broadcast %94 : vector<8x1xf32> to vector<8x8xf32>
    %96 = arith.subf %92, %95 : vector<8x8xf32>
    %97 = math.exp %96 : vector<8x8xf32>
    %cst_56 = arith.constant dense<0.000000e+00> : vector<8xf32>
    %98 = vector.multi_reduction <add>, %97, %cst_56 [1] : vector<8x8xf32> to vector<8xf32>
    %99 = vector.shape_cast %98 : vector<8xf32> to vector<8x1xf32>
    %100 = tpu.reciprocal %99 {approx = true} : vector<8x1xf32> -> vector<8x1xf32>
    %101 = vector.broadcast %100 : vector<8x1xf32> to vector<8x8xf32>
    %102 = arith.mulf %97, %101 : vector<8x8xf32>
    %cst_57 = arith.constant dense<0xFF800000> : vector<8xf32>
    %103 = vector.multi_reduction <maximumf>, %92, %cst_57 [0] : vector<8x8xf32> to vector<8xf32>
    %104 = vector.shape_cast %103 : vector<8xf32> to vector<1x8xf32>
    %105 = vector.broadcast %104 : vector<1x8xf32> to vector<8x8xf32>
    %106 = arith.subf %92, %105 : vector<8x8xf32>
    %107 = math.exp %106 : vector<8x8xf32>
    %cst_58 = arith.constant dense<0.000000e+00> : vector<8xf32>
    %108 = vector.multi_reduction <add>, %107, %cst_58 [0] : vector<8x8xf32> to vector<8xf32>
    %109 = vector.shape_cast %108 : vector<8xf32> to vector<1x8xf32>
    %110 = tpu.reciprocal %109 {approx = true} : vector<1x8xf32> -> vector<1x8xf32>
    %111 = vector.broadcast %110 : vector<1x8xf32> to vector<8x8xf32>
    %112 = arith.mulf %107, %111 : vector<8x8xf32>
    %113 = arith.truncf %102 : vector<8x8xf32> to vector<8x8xbf16>
    %cst_59 = arith.constant dense<0.000000e+00> : vector<8x8xf32>
    %114 = tpu.matmul %113, %91, %cst_59 {dimension_numbers = #tpu.dot_dimension_numbers<[1], [0], [0], [1], [0, 0, 1, 1], [], []>} : vector<8x8xbf16>, vector<8x8xbf16>, vector<8x8xf32> -> vector<8x8xf32>
    %115 = arith.truncf %112 : vector<8x8xf32> to vector<8x8xbf16>
    %cst_60 = arith.constant dense<0.000000e+00> : vector<8x8xf32>
    %116 = tpu.matmul %115, %87, %cst_60 {dimension_numbers = #tpu.dot_dimension_numbers<[0], [0], [1], [1], [0, 1, 1, 1], [], []>} : vector<8x8xbf16>, vector<8x8xbf16>, vector<8x8xf32> -> vector<8x8xf32>
    %117 = arith.truncf %114 : vector<8x8xf32> to vector<8x8xbf16>
    %cst_61 = arith.constant dense<0.000000e+00> : vector<8x32xf32>
    %118 = tpu.matmul %117, %75, %cst_61 {dimension_numbers = #tpu.dot_dimension_numbers<[1], [0], [0], [1], [0, 0, 1, 1], [], []>} : vector<8x8xbf16>, vector<8x32xbf16>, vector<8x32xf32> -> vector<8x32xf32>
    %119 = arith.addf %62, %118 : vector<8x32xf32>
    %120 = arith.truncf %116 : vector<8x8xf32> to vector<8x8xbf16>
    %cst_62 = arith.constant dense<0.000000e+00> : vector<8x32xf32>
    %121 = tpu.matmul %120, %75, %cst_62 {dimension_numbers = #tpu.dot_dimension_numbers<[1], [0], [0], [1], [0, 0, 1, 1], [], []>} : vector<8x8xbf16>, vector<8x32xbf16>, vector<8x32xf32> -> vector<8x32xf32>
    %122 = arith.addf %65, %121 : vector<8x32xf32>
    %c2 = arith.constant 2 : index
    %c0_63 = arith.constant 0 : index
    %c0_64 = arith.constant 0 : index
    %123 = vector.load %arg3[%c2, %c0_63, %c0_64] : memref<4x32x8xbf16, #tpu.memory_space<vmem>>, vector<1x32x8xbf16>
    %124 = vector.shape_cast %123 : vector<1x32x8xbf16> to vector<32x8xbf16>
    %c2_65 = arith.constant 2 : index
    %c0_66 = arith.constant 0 : index
    %c0_67 = arith.constant 0 : index
    %125 = vector.load %arg4[%c2_65, %c0_66, %c0_67] : memref<4x1x8xf32, #tpu.memory_space<vmem>>, vector<1x1x8xf32>
    %126 = vector.shape_cast %125 : vector<1x1x8xf32> to vector<1x8xf32>
    %c2_68 = arith.constant 2 : index
    %c0_69 = arith.constant 0 : index
    %c0_70 = arith.constant 0 : index
    %127 = vector.load %arg5[%c2_68, %c0_69, %c0_70] : memref<4x32x8xbf16, #tpu.memory_space<vmem>>, vector<1x32x8xbf16>
    %128 = vector.shape_cast %127 : vector<1x32x8xbf16> to vector<32x8xbf16>
    %c2_71 = arith.constant 2 : index
    %c0_72 = arith.constant 0 : index
    %c0_73 = arith.constant 0 : index
    %129 = vector.load %arg6[%c2_71, %c0_72, %c0_73] : memref<4x1x8xf32, #tpu.memory_space<vmem>>, vector<1x1x8xf32>
    %130 = vector.shape_cast %129 : vector<1x1x8xf32> to vector<1x8xf32>
    %c2_74 = arith.constant 2 : index
    %c0_75 = arith.constant 0 : index
    %c0_76 = arith.constant 0 : index
    %131 = vector.load %arg7[%c2_74, %c0_75, %c0_76] : memref<4x8x32xbf16, #tpu.memory_space<vmem>>, vector<1x8x32xbf16>
    %132 = vector.shape_cast %131 : vector<1x8x32xbf16> to vector<8x32xbf16>
    %cst_77 = arith.constant dense<0.000000e+00> : vector<8x8xf32>
    %133 = tpu.matmul %4, %124, %cst_77 {dimension_numbers = #tpu.dot_dimension_numbers<[1], [0], [0], [1], [0, 0, 1, 1], [], []>} : vector<8x32xbf16>, vector<32x8xbf16>, vector<8x8xf32> -> vector<8x8xf32>
    %134 = vector.broadcast %126 : vector<1x8xf32> to vector<8x8xf32>
    %135 = arith.addf %133, %134 : vector<8x8xf32>
    %136 = arith.truncf %135 : vector<8x8xf32> to vector<8x8xbf16>
    %cst_78 = arith.constant dense<0.000000e+00> : vector<8x8xf32>
    %137 = tpu.matmul %5, %124, %cst_78 {dimension_numbers = #tpu.dot_dimension_numbers<[1], [0], [0], [1], [0, 0, 1, 1], [], []>} : vector<8x32xbf16>, vector<32x8xbf16>, vector<8x8xf32> -> vector<8x8xf32>
    %138 = vector.broadcast %126 : vector<1x8xf32> to vector<8x8xf32>
    %139 = arith.addf %137, %138 : vector<8x8xf32>
    %140 = arith.truncf %139 : vector<8x8xf32> to vector<8x8xbf16>
    %cst_79 = arith.constant dense<0.000000e+00> : vector<8x8xf32>
    %141 = tpu.matmul %4, %128, %cst_79 {dimension_numbers = #tpu.dot_dimension_numbers<[1], [0], [0], [1], [0, 0, 1, 1], [], []>} : vector<8x32xbf16>, vector<32x8xbf16>, vector<8x8xf32> -> vector<8x8xf32>
    %142 = vector.broadcast %130 : vector<1x8xf32> to vector<8x8xf32>
    %143 = arith.addf %141, %142 : vector<8x8xf32>
    %144 = arith.truncf %143 : vector<8x8xf32> to vector<8x8xbf16>
    %cst_80 = arith.constant dense<0.000000e+00> : vector<8x8xf32>
    %145 = tpu.matmul %5, %128, %cst_80 {dimension_numbers = #tpu.dot_dimension_numbers<[1], [0], [0], [1], [0, 0, 1, 1], [], []>} : vector<8x32xbf16>, vector<32x8xbf16>, vector<8x8xf32> -> vector<8x8xf32>
    %146 = vector.broadcast %130 : vector<1x8xf32> to vector<8x8xf32>
    %147 = arith.addf %145, %146 : vector<8x8xf32>
    %148 = arith.truncf %147 : vector<8x8xf32> to vector<8x8xbf16>
    %cst_81 = arith.constant dense<0.000000e+00> : vector<8x8xf32>
    %149 = tpu.matmul %136, %140, %cst_81 {dimension_numbers = #tpu.dot_dimension_numbers<[1], [1], [0], [0], [0, 0, 1, 0], [], []>} : vector<8x8xbf16>, vector<8x8xbf16>, vector<8x8xf32> -> vector<8x8xf32>
    %cst_82 = arith.constant dense<0xFF800000> : vector<8xf32>
    %150 = vector.multi_reduction <maximumf>, %149, %cst_82 [1] : vector<8x8xf32> to vector<8xf32>
    %151 = vector.shape_cast %150 : vector<8xf32> to vector<8x1xf32>
    %152 = vector.broadcast %151 : vector<8x1xf32> to vector<8x8xf32>
    %153 = arith.subf %149, %152 : vector<8x8xf32>
    %154 = math.exp %153 : vector<8x8xf32>
    %cst_83 = arith.constant dense<0.000000e+00> : vector<8xf32>
    %155 = vector.multi_reduction <add>, %154, %cst_83 [1] : vector<8x8xf32> to vector<8xf32>
    %156 = vector.shape_cast %155 : vector<8xf32> to vector<8x1xf32>
    %157 = tpu.reciprocal %156 {approx = true} : vector<8x1xf32> -> vector<8x1xf32>
    %158 = vector.broadcast %157 : vector<8x1xf32> to vector<8x8xf32>
    %159 = arith.mulf %154, %158 : vector<8x8xf32>
    %cst_84 = arith.constant dense<0xFF800000> : vector<8xf32>
    %160 = vector.multi_reduction <maximumf>, %149, %cst_84 [0] : vector<8x8xf32> to vector<8xf32>
    %161 = vector.shape_cast %160 : vector<8xf32> to vector<1x8xf32>
    %162 = vector.broadcast %161 : vector<1x8xf32> to vector<8x8xf32>
    %163 = arith.subf %149, %162 : vector<8x8xf32>
    %164 = math.exp %163 : vector<8x8xf32>
    %cst_85 = arith.constant dense<0.000000e+00> : vector<8xf32>
    %165 = vector.multi_reduction <add>, %164, %cst_85 [0] : vector<8x8xf32> to vector<8xf32>
    %166 = vector.shape_cast %165 : vector<8xf32> to vector<1x8xf32>
    %167 = tpu.reciprocal %166 {approx = true} : vector<1x8xf32> -> vector<1x8xf32>
    %168 = vector.broadcast %167 : vector<1x8xf32> to vector<8x8xf32>
    %169 = arith.mulf %164, %168 : vector<8x8xf32>
    %170 = arith.truncf %159 : vector<8x8xf32> to vector<8x8xbf16>
    %cst_86 = arith.constant dense<0.000000e+00> : vector<8x8xf32>
    %171 = tpu.matmul %170, %148, %cst_86 {dimension_numbers = #tpu.dot_dimension_numbers<[1], [0], [0], [1], [0, 0, 1, 1], [], []>} : vector<8x8xbf16>, vector<8x8xbf16>, vector<8x8xf32> -> vector<8x8xf32>
    %172 = arith.truncf %169 : vector<8x8xf32> to vector<8x8xbf16>
    %cst_87 = arith.constant dense<0.000000e+00> : vector<8x8xf32>
    %173 = tpu.matmul %172, %144, %cst_87 {dimension_numbers = #tpu.dot_dimension_numbers<[0], [0], [1], [1], [0, 1, 1, 1], [], []>} : vector<8x8xbf16>, vector<8x8xbf16>, vector<8x8xf32> -> vector<8x8xf32>
    %174 = arith.truncf %171 : vector<8x8xf32> to vector<8x8xbf16>
    %cst_88 = arith.constant dense<0.000000e+00> : vector<8x32xf32>
    %175 = tpu.matmul %174, %132, %cst_88 {dimension_numbers = #tpu.dot_dimension_numbers<[1], [0], [0], [1], [0, 0, 1, 1], [], []>} : vector<8x8xbf16>, vector<8x32xbf16>, vector<8x32xf32> -> vector<8x32xf32>
    %176 = arith.addf %119, %175 : vector<8x32xf32>
    %177 = arith.truncf %173 : vector<8x8xf32> to vector<8x8xbf16>
    %cst_89 = arith.constant dense<0.000000e+00> : vector<8x32xf32>
    %178 = tpu.matmul %177, %132, %cst_89 {dimension_numbers = #tpu.dot_dimension_numbers<[1], [0], [0], [1], [0, 0, 1, 1], [], []>} : vector<8x8xbf16>, vector<8x32xbf16>, vector<8x32xf32> -> vector<8x32xf32>
    %179 = arith.addf %122, %178 : vector<8x32xf32>
    %c3 = arith.constant 3 : index
    %c0_90 = arith.constant 0 : index
    %c0_91 = arith.constant 0 : index
    %180 = vector.load %arg3[%c3, %c0_90, %c0_91] : memref<4x32x8xbf16, #tpu.memory_space<vmem>>, vector<1x32x8xbf16>
    %181 = vector.shape_cast %180 : vector<1x32x8xbf16> to vector<32x8xbf16>
    %c3_92 = arith.constant 3 : index
    %c0_93 = arith.constant 0 : index
    %c0_94 = arith.constant 0 : index
    %182 = vector.load %arg4[%c3_92, %c0_93, %c0_94] : memref<4x1x8xf32, #tpu.memory_space<vmem>>, vector<1x1x8xf32>
    %183 = vector.shape_cast %182 : vector<1x1x8xf32> to vector<1x8xf32>
    %c3_95 = arith.constant 3 : index
    %c0_96 = arith.constant 0 : index
    %c0_97 = arith.constant 0 : index
    %184 = vector.load %arg5[%c3_95, %c0_96, %c0_97] : memref<4x32x8xbf16, #tpu.memory_space<vmem>>, vector<1x32x8xbf16>
    %185 = vector.shape_cast %184 : vector<1x32x8xbf16> to vector<32x8xbf16>
    %c3_98 = arith.constant 3 : index
    %c0_99 = arith.constant 0 : index
    %c0_100 = arith.constant 0 : index
    %186 = vector.load %arg6[%c3_98, %c0_99, %c0_100] : memref<4x1x8xf32, #tpu.memory_space<vmem>>, vector<1x1x8xf32>
    %187 = vector.shape_cast %186 : vector<1x1x8xf32> to vector<1x8xf32>
    %c3_101 = arith.constant 3 : index
    %c0_102 = arith.constant 0 : index
    %c0_103 = arith.constant 0 : index
    %188 = vector.load %arg7[%c3_101, %c0_102, %c0_103] : memref<4x8x32xbf16, #tpu.memory_space<vmem>>, vector<1x8x32xbf16>
    %189 = vector.shape_cast %188 : vector<1x8x32xbf16> to vector<8x32xbf16>
    %cst_104 = arith.constant dense<0.000000e+00> : vector<8x8xf32>
    %190 = tpu.matmul %4, %181, %cst_104 {dimension_numbers = #tpu.dot_dimension_numbers<[1], [0], [0], [1], [0, 0, 1, 1], [], []>} : vector<8x32xbf16>, vector<32x8xbf16>, vector<8x8xf32> -> vector<8x8xf32>
    %191 = vector.broadcast %183 : vector<1x8xf32> to vector<8x8xf32>
    %192 = arith.addf %190, %191 : vector<8x8xf32>
    %193 = arith.truncf %192 : vector<8x8xf32> to vector<8x8xbf16>
    %cst_105 = arith.constant dense<0.000000e+00> : vector<8x8xf32>
    %194 = tpu.matmul %5, %181, %cst_105 {dimension_numbers = #tpu.dot_dimension_numbers<[1], [0], [0], [1], [0, 0, 1, 1], [], []>} : vector<8x32xbf16>, vector<32x8xbf16>, vector<8x8xf32> -> vector<8x8xf32>
    %195 = vector.broadcast %183 : vector<1x8xf32> to vector<8x8xf32>
    %196 = arith.addf %194, %195 : vector<8x8xf32>
    %197 = arith.truncf %196 : vector<8x8xf32> to vector<8x8xbf16>
    %cst_106 = arith.constant dense<0.000000e+00> : vector<8x8xf32>
    %198 = tpu.matmul %4, %185, %cst_106 {dimension_numbers = #tpu.dot_dimension_numbers<[1], [0], [0], [1], [0, 0, 1, 1], [], []>} : vector<8x32xbf16>, vector<32x8xbf16>, vector<8x8xf32> -> vector<8x8xf32>
    %199 = vector.broadcast %187 : vector<1x8xf32> to vector<8x8xf32>
    %200 = arith.addf %198, %199 : vector<8x8xf32>
    %201 = arith.truncf %200 : vector<8x8xf32> to vector<8x8xbf16>
    %cst_107 = arith.constant dense<0.000000e+00> : vector<8x8xf32>
    %202 = tpu.matmul %5, %185, %cst_107 {dimension_numbers = #tpu.dot_dimension_numbers<[1], [0], [0], [1], [0, 0, 1, 1], [], []>} : vector<8x32xbf16>, vector<32x8xbf16>, vector<8x8xf32> -> vector<8x8xf32>
    %203 = vector.broadcast %187 : vector<1x8xf32> to vector<8x8xf32>
    %204 = arith.addf %202, %203 : vector<8x8xf32>
    %205 = arith.truncf %204 : vector<8x8xf32> to vector<8x8xbf16>
    %cst_108 = arith.constant dense<0.000000e+00> : vector<8x8xf32>
    %206 = tpu.matmul %193, %197, %cst_108 {dimension_numbers = #tpu.dot_dimension_numbers<[1], [1], [0], [0], [0, 0, 1, 0], [], []>} : vector<8x8xbf16>, vector<8x8xbf16>, vector<8x8xf32> -> vector<8x8xf32>
    %cst_109 = arith.constant dense<0xFF800000> : vector<8xf32>
    %207 = vector.multi_reduction <maximumf>, %206, %cst_109 [1] : vector<8x8xf32> to vector<8xf32>
    %208 = vector.shape_cast %207 : vector<8xf32> to vector<8x1xf32>
    %209 = vector.broadcast %208 : vector<8x1xf32> to vector<8x8xf32>
    %210 = arith.subf %206, %209 : vector<8x8xf32>
    %211 = math.exp %210 : vector<8x8xf32>
    %cst_110 = arith.constant dense<0.000000e+00> : vector<8xf32>
    %212 = vector.multi_reduction <add>, %211, %cst_110 [1] : vector<8x8xf32> to vector<8xf32>
    %213 = vector.shape_cast %212 : vector<8xf32> to vector<8x1xf32>
    %214 = tpu.reciprocal %213 {approx = true} : vector<8x1xf32> -> vector<8x1xf32>
    %215 = vector.broadcast %214 : vector<8x1xf32> to vector<8x8xf32>
    %216 = arith.mulf %211, %215 : vector<8x8xf32>
    %cst_111 = arith.constant dense<0xFF800000> : vector<8xf32>
    %217 = vector.multi_reduction <maximumf>, %206, %cst_111 [0] : vector<8x8xf32> to vector<8xf32>
    %218 = vector.shape_cast %217 : vector<8xf32> to vector<1x8xf32>
    %219 = vector.broadcast %218 : vector<1x8xf32> to vector<8x8xf32>
    %220 = arith.subf %206, %219 : vector<8x8xf32>
    %221 = math.exp %220 : vector<8x8xf32>
    %cst_112 = arith.constant dense<0.000000e+00> : vector<8xf32>
    %222 = vector.multi_reduction <add>, %221, %cst_112 [0] : vector<8x8xf32> to vector<8xf32>
    %223 = vector.shape_cast %222 : vector<8xf32> to vector<1x8xf32>
    %224 = tpu.reciprocal %223 {approx = true} : vector<1x8xf32> -> vector<1x8xf32>
    %225 = vector.broadcast %224 : vector<1x8xf32> to vector<8x8xf32>
    %226 = arith.mulf %221, %225 : vector<8x8xf32>
    %227 = arith.truncf %216 : vector<8x8xf32> to vector<8x8xbf16>
    %cst_113 = arith.constant dense<0.000000e+00> : vector<8x8xf32>
    %228 = tpu.matmul %227, %205, %cst_113 {dimension_numbers = #tpu.dot_dimension_numbers<[1], [0], [0], [1], [0, 0, 1, 1], [], []>} : vector<8x8xbf16>, vector<8x8xbf16>, vector<8x8xf32> -> vector<8x8xf32>
    %229 = arith.truncf %226 : vector<8x8xf32> to vector<8x8xbf16>
    %cst_114 = arith.constant dense<0.000000e+00> : vector<8x8xf32>
    %230 = tpu.matmul %229, %201, %cst_114 {dimension_numbers = #tpu.dot_dimension_numbers<[0], [0], [1], [1], [0, 1, 1, 1], [], []>} : vector<8x8xbf16>, vector<8x8xbf16>, vector<8x8xf32> -> vector<8x8xf32>
    %231 = arith.truncf %228 : vector<8x8xf32> to vector<8x8xbf16>
    %cst_115 = arith.constant dense<0.000000e+00> : vector<8x32xf32>
    %232 = tpu.matmul %231, %189, %cst_115 {dimension_numbers = #tpu.dot_dimension_numbers<[1], [0], [0], [1], [0, 0, 1, 1], [], []>} : vector<8x8xbf16>, vector<8x32xbf16>, vector<8x32xf32> -> vector<8x32xf32>
    %233 = arith.addf %176, %232 : vector<8x32xf32>
    %234 = arith.truncf %230 : vector<8x8xf32> to vector<8x8xbf16>
    %cst_116 = arith.constant dense<0.000000e+00> : vector<8x32xf32>
    %235 = tpu.matmul %234, %189, %cst_116 {dimension_numbers = #tpu.dot_dimension_numbers<[1], [0], [0], [1], [0, 0, 1, 1], [], []>} : vector<8x8xbf16>, vector<8x32xbf16>, vector<8x32xf32> -> vector<8x32xf32>
    %236 = arith.addf %179, %235 : vector<8x32xf32>
    %237 = vector.broadcast %6 : vector<1x32xf32> to vector<8x32xf32>
    %238 = arith.addf %233, %237 : vector<8x32xf32>
    %239 = vector.broadcast %6 : vector<1x32xf32> to vector<8x32xf32>
    %240 = arith.addf %236, %239 : vector<8x32xf32>
    %c0_117 = arith.constant 0 : index
    %c0_118 = arith.constant 0 : index
    %241 = vector.load %arg9[%c0_117, %c0_118] : memref<32x64xbf16, #tpu.memory_space<vmem>>, vector<32x64xbf16>
    %c0_119 = arith.constant 0 : index
    %c0_120 = arith.constant 0 : index
    %242 = vector.load %arg10[%c0_119, %c0_120] : memref<32x64xbf16, #tpu.memory_space<vmem>>, vector<32x64xbf16>
    %c0_121 = arith.constant 0 : index
    %c0_122 = arith.constant 0 : index
    %243 = vector.load %arg11[%c0_121, %c0_122] : memref<1x64xf32, #tpu.memory_space<vmem>>, vector<1x64xf32>
    %c0_123 = arith.constant 0 : index
    %c0_124 = arith.constant 0 : index
    %244 = vector.load %arg12[%c0_123, %c0_124] : memref<1x64xf32, #tpu.memory_space<vmem>>, vector<1x64xf32>
    %c0_125 = arith.constant 0 : index
    %c0_126 = arith.constant 0 : index
    %245 = vector.load %arg13[%c0_125, %c0_126] : memref<1x64xf32, #tpu.memory_space<vmem>>, vector<1x64xf32>
    %c0_127 = arith.constant 0 : index
    %c0_128 = arith.constant 0 : index
    %246 = vector.load %arg14[%c0_127, %c0_128] : memref<64x32xbf16, #tpu.memory_space<vmem>>, vector<64x32xbf16>
    %c0_129 = arith.constant 0 : index
    %c0_130 = arith.constant 0 : index
    %247 = vector.load %arg15[%c0_129, %c0_130] : memref<1x32xf32, #tpu.memory_space<vmem>>, vector<1x32xf32>
    %cst_131 = arith.constant dense<0.000000e+00> : vector<8x64xf32>
    %248 = tpu.matmul %4, %241, %cst_131 {dimension_numbers = #tpu.dot_dimension_numbers<[1], [0], [0], [1], [0, 0, 1, 1], [], []>} : vector<8x32xbf16>, vector<32x64xbf16>, vector<8x64xf32> -> vector<8x64xf32>
    %249 = arith.truncf %238 : vector<8x32xf32> to vector<8x32xbf16>
    %cst_132 = arith.constant dense<0.000000e+00> : vector<8x64xf32>
    %250 = tpu.matmul %249, %242, %cst_132 {dimension_numbers = #tpu.dot_dimension_numbers<[1], [0], [0], [1], [0, 0, 1, 1], [], []>} : vector<8x32xbf16>, vector<32x64xbf16>, vector<8x64xf32> -> vector<8x64xf32>
    %251 = arith.addf %248, %250 : vector<8x64xf32>
    %252 = vector.broadcast %243 : vector<1x64xf32> to vector<8x64xf32>
    %253 = arith.addf %251, %252 : vector<8x64xf32>
    %cst_133 = arith.constant dense<0.000000e+00> : vector<8xf32>
    %254 = vector.multi_reduction <add>, %253, %cst_133 [1] : vector<8x64xf32> to vector<8xf32>
    %255 = vector.shape_cast %254 : vector<8xf32> to vector<8x1xf32>
    %cst_134 = arith.constant 6.400000e+01 : f32
    %256 = vector.broadcast %cst_134 : f32 to vector<8x1xf32>
    %257 = arith.divf %255, %256 : vector<8x1xf32>
    %258 = vector.broadcast %257 : vector<8x1xf32> to vector<8x64xf32>
    %259 = arith.subf %253, %258 : vector<8x64xf32>
    %260 = arith.mulf %259, %259 : vector<8x64xf32>
    %cst_135 = arith.constant dense<0.000000e+00> : vector<8xf32>
    %261 = vector.multi_reduction <add>, %260, %cst_135 [1] : vector<8x64xf32> to vector<8xf32>
    %262 = vector.shape_cast %261 : vector<8xf32> to vector<8x1xf32>
    %cst_136 = arith.constant 6.400000e+01 : f32
    %263 = vector.broadcast %cst_136 : f32 to vector<8x1xf32>
    %264 = arith.divf %262, %263 : vector<8x1xf32>
    %cst_137 = arith.constant 9.99999974E-6 : f32
    %265 = vector.broadcast %cst_137 : f32 to vector<8x1xf32>
    %266 = arith.addf %264, %265 : vector<8x1xf32>
    %267 = math.rsqrt %266 : vector<8x1xf32>
    %268 = vector.broadcast %267 : vector<8x1xf32> to vector<8x64xf32>
    %269 = arith.mulf %259, %268 : vector<8x64xf32>
    %270 = vector.broadcast %244 : vector<1x64xf32> to vector<8x64xf32>
    %271 = arith.mulf %269, %270 : vector<8x64xf32>
    %272 = vector.broadcast %245 : vector<1x64xf32> to vector<8x64xf32>
    %273 = arith.addf %271, %272 : vector<8x64xf32>
    %cst_138 = arith.constant 5.000000e-01 : f32
    %274 = vector.broadcast %cst_138 : f32 to vector<8x64xf32>
    %275 = arith.mulf %274, %273 : vector<8x64xf32>
    %cst_139 = arith.constant 0.707106769 : f32
    %276 = vector.broadcast %cst_139 : f32 to vector<8x64xf32>
    %277 = arith.mulf %273, %276 : vector<8x64xf32>
    %cst_140 = arith.constant 0.000000e+00 : f32
    %278 = vector.broadcast %cst_140 : f32 to vector<8x64xf32>
    %279 = arith.cmpf oge, %277, %278 : vector<8x64xf32>
    %cst_141 = arith.constant 1.000000e+00 : f32
    %cst_142 = arith.constant -1.000000e+00 : f32
    %280 = vector.broadcast %cst_141 : f32 to vector<8x64xf32>
    %281 = vector.broadcast %cst_142 : f32 to vector<8x64xf32>
    %282 = arith.select %279, %280, %281 : vector<8x64xi1>, vector<8x64xf32>
    %283 = math.absf %277 : vector<8x64xf32>
    %cst_143 = arith.constant 0.327591091 : f32
    %284 = vector.broadcast %cst_143 : f32 to vector<8x64xf32>
    %285 = arith.mulf %284, %283 : vector<8x64xf32>
    %cst_144 = arith.constant 1.000000e+00 : f32
    %286 = vector.broadcast %cst_144 : f32 to vector<8x64xf32>
    %287 = arith.addf %286, %285 : vector<8x64xf32>
    %cst_145 = arith.constant 1.000000e+00 : f32
    %288 = vector.broadcast %cst_145 : f32 to vector<8x64xf32>
    %289 = arith.divf %288, %287 : vector<8x64xf32>
    %cst_146 = arith.constant 1.06140542 : f32
    %290 = vector.broadcast %cst_146 : f32 to vector<8x64xf32>
    %291 = arith.mulf %289, %290 : vector<8x64xf32>
    %cst_147 = arith.constant -1.45315206 : f32
    %292 = vector.broadcast %cst_147 : f32 to vector<8x64xf32>
    %293 = arith.addf %292, %291 : vector<8x64xf32>
    %294 = arith.mulf %289, %293 : vector<8x64xf32>
    %cst_148 = arith.constant 1.42141378 : f32
    %295 = vector.broadcast %cst_148 : f32 to vector<8x64xf32>
    %296 = arith.addf %295, %294 : vector<8x64xf32>
    %297 = arith.mulf %289, %296 : vector<8x64xf32>
    %cst_149 = arith.constant -0.284496725 : f32
    %298 = vector.broadcast %cst_149 : f32 to vector<8x64xf32>
    %299 = arith.addf %298, %297 : vector<8x64xf32>
    %300 = arith.mulf %289, %299 : vector<8x64xf32>
    %cst_150 = arith.constant 0.254829586 : f32
    %301 = vector.broadcast %cst_150 : f32 to vector<8x64xf32>
    %302 = arith.addf %301, %300 : vector<8x64xf32>
    %303 = arith.mulf %289, %302 : vector<8x64xf32>
    %cst_151 = arith.constant 0.000000e+00 : f32
    %304 = vector.broadcast %cst_151 : f32 to vector<8x64xf32>
    %305 = arith.subf %304, %283 : vector<8x64xf32>
    %306 = arith.mulf %305, %283 : vector<8x64xf32>
    %307 = math.exp %306 : vector<8x64xf32>
    %308 = arith.mulf %303, %307 : vector<8x64xf32>
    %cst_152 = arith.constant 1.000000e+00 : f32
    %309 = vector.broadcast %cst_152 : f32 to vector<8x64xf32>
    %310 = arith.subf %309, %308 : vector<8x64xf32>
    %311 = arith.mulf %282, %310 : vector<8x64xf32>
    %cst_153 = arith.constant 1.000000e+00 : f32
    %312 = vector.broadcast %cst_153 : f32 to vector<8x64xf32>
    %313 = arith.addf %312, %311 : vector<8x64xf32>
    %314 = arith.mulf %275, %313 : vector<8x64xf32>
    %315 = arith.truncf %314 : vector<8x64xf32> to vector<8x64xbf16>
    %cst_154 = arith.constant dense<0.000000e+00> : vector<8x32xf32>
    %316 = tpu.matmul %315, %246, %cst_154 {dimension_numbers = #tpu.dot_dimension_numbers<[1], [0], [0], [1], [0, 0, 1, 1], [], []>} : vector<8x64xbf16>, vector<64x32xbf16>, vector<8x32xf32> -> vector<8x32xf32>
    %317 = vector.broadcast %247 : vector<1x32xf32> to vector<8x32xf32>
    %318 = arith.addf %316, %317 : vector<8x32xf32>
    %319 = arith.addf %1, %318 : vector<8x32xf32>
    %c0_155 = arith.constant 0 : index
    %c0_156 = arith.constant 0 : index
    %c0_157 = arith.constant 0 : index
    %320 = vector.load %arg16[%c0_155, %c0_156, %c0_157] : memref<1x8x32xf32, #tpu.memory_space<vmem>>, vector<1x8x32xf32>
    %321 = vector.shape_cast %320 : vector<1x8x32xf32> to vector<8x32xf32>
    %322 = vector.shape_cast %319 : vector<8x32xf32> to vector<1x8x32xf32>
    tpu.vector_store %arg16[%c0_155, %c0_156, %c0_157], %322 {strides = array<i32>} : memref<1x8x32xf32, #tpu.memory_space<vmem>>, vector<1x8x32xf32>,
    %cst_158 = arith.constant dense<0.000000e+00> : vector<8x64xf32>
    %323 = tpu.matmul %5, %241, %cst_158 {dimension_numbers = #tpu.dot_dimension_numbers<[1], [0], [0], [1], [0, 0, 1, 1], [], []>} : vector<8x32xbf16>, vector<32x64xbf16>, vector<8x64xf32> -> vector<8x64xf32>
    %324 = arith.truncf %240 : vector<8x32xf32> to vector<8x32xbf16>
    %cst_159 = arith.constant dense<0.000000e+00> : vector<8x64xf32>
    %325 = tpu.matmul %324, %242, %cst_159 {dimension_numbers = #tpu.dot_dimension_numbers<[1], [0], [0], [1], [0, 0, 1, 1], [], []>} : vector<8x32xbf16>, vector<32x64xbf16>, vector<8x64xf32> -> vector<8x64xf32>
    %326 = arith.addf %323, %325 : vector<8x64xf32>
    %327 = vector.broadcast %243 : vector<1x64xf32> to vector<8x64xf32>
    %328 = arith.addf %326, %327 : vector<8x64xf32>
    %cst_160 = arith.constant dense<0.000000e+00> : vector<8xf32>
    %329 = vector.multi_reduction <add>, %328, %cst_160 [1] : vector<8x64xf32> to vector<8xf32>
    %330 = vector.shape_cast %329 : vector<8xf32> to vector<8x1xf32>
    %cst_161 = arith.constant 6.400000e+01 : f32
    %331 = vector.broadcast %cst_161 : f32 to vector<8x1xf32>
    %332 = arith.divf %330, %331 : vector<8x1xf32>
    %333 = vector.broadcast %332 : vector<8x1xf32> to vector<8x64xf32>
    %334 = arith.subf %328, %333 : vector<8x64xf32>
    %335 = arith.mulf %334, %334 : vector<8x64xf32>
    %cst_162 = arith.constant dense<0.000000e+00> : vector<8xf32>
    %336 = vector.multi_reduction <add>, %335, %cst_162 [1] : vector<8x64xf32> to vector<8xf32>
    %337 = vector.shape_cast %336 : vector<8xf32> to vector<8x1xf32>
    %cst_163 = arith.constant 6.400000e+01 : f32
    %338 = vector.broadcast %cst_163 : f32 to vector<8x1xf32>
    %339 = arith.divf %337, %338 : vector<8x1xf32>
    %cst_164 = arith.constant 9.99999974E-6 : f32
    %340 = vector.broadcast %cst_164 : f32 to vector<8x1xf32>
    %341 = arith.addf %339, %340 : vector<8x1xf32>
    %342 = math.rsqrt %341 : vector<8x1xf32>
    %343 = vector.broadcast %342 : vector<8x1xf32> to vector<8x64xf32>
    %344 = arith.mulf %334, %343 : vector<8x64xf32>
    %345 = vector.broadcast %244 : vector<1x64xf32> to vector<8x64xf32>
    %346 = arith.mulf %344, %345 : vector<8x64xf32>
    %347 = vector.broadcast %245 : vector<1x64xf32> to vector<8x64xf32>
    %348 = arith.addf %346, %347 : vector<8x64xf32>
    %cst_165 = arith.constant 5.000000e-01 : f32
    %349 = vector.broadcast %cst_165 : f32 to vector<8x64xf32>
    %350 = arith.mulf %349, %348 : vector<8x64xf32>
    %cst_166 = arith.constant 0.707106769 : f32
    %351 = vector.broadcast %cst_166 : f32 to vector<8x64xf32>
    %352 = arith.mulf %348, %351 : vector<8x64xf32>
    %cst_167 = arith.constant 0.000000e+00 : f32
    %353 = vector.broadcast %cst_167 : f32 to vector<8x64xf32>
    %354 = arith.cmpf oge, %352, %353 : vector<8x64xf32>
    %cst_168 = arith.constant 1.000000e+00 : f32
    %cst_169 = arith.constant -1.000000e+00 : f32
    %355 = vector.broadcast %cst_168 : f32 to vector<8x64xf32>
    %356 = vector.broadcast %cst_169 : f32 to vector<8x64xf32>
    %357 = arith.select %354, %355, %356 : vector<8x64xi1>, vector<8x64xf32>
    %358 = math.absf %352 : vector<8x64xf32>
    %cst_170 = arith.constant 0.327591091 : f32
    %359 = vector.broadcast %cst_170 : f32 to vector<8x64xf32>
    %360 = arith.mulf %359, %358 : vector<8x64xf32>
    %cst_171 = arith.constant 1.000000e+00 : f32
    %361 = vector.broadcast %cst_171 : f32 to vector<8x64xf32>
    %362 = arith.addf %361, %360 : vector<8x64xf32>
    %cst_172 = arith.constant 1.000000e+00 : f32
    %363 = vector.broadcast %cst_172 : f32 to vector<8x64xf32>
    %364 = arith.divf %363, %362 : vector<8x64xf32>
    %cst_173 = arith.constant 1.06140542 : f32
    %365 = vector.broadcast %cst_173 : f32 to vector<8x64xf32>
    %366 = arith.mulf %364, %365 : vector<8x64xf32>
    %cst_174 = arith.constant -1.45315206 : f32
    %367 = vector.broadcast %cst_174 : f32 to vector<8x64xf32>
    %368 = arith.addf %367, %366 : vector<8x64xf32>
    %369 = arith.mulf %364, %368 : vector<8x64xf32>
    %cst_175 = arith.constant 1.42141378 : f32
    %370 = vector.broadcast %cst_175 : f32 to vector<8x64xf32>
    %371 = arith.addf %370, %369 : vector<8x64xf32>
    %372 = arith.mulf %364, %371 : vector<8x64xf32>
    %cst_176 = arith.constant -0.284496725 : f32
    %373 = vector.broadcast %cst_176 : f32 to vector<8x64xf32>
    %374 = arith.addf %373, %372 : vector<8x64xf32>
    %375 = arith.mulf %364, %374 : vector<8x64xf32>
    %cst_177 = arith.constant 0.254829586 : f32
    %376 = vector.broadcast %cst_177 : f32 to vector<8x64xf32>
    %377 = arith.addf %376, %375 : vector<8x64xf32>
    %378 = arith.mulf %364, %377 : vector<8x64xf32>
    %cst_178 = arith.constant 0.000000e+00 : f32
    %379 = vector.broadcast %cst_178 : f32 to vector<8x64xf32>
    %380 = arith.subf %379, %358 : vector<8x64xf32>
    %381 = arith.mulf %380, %358 : vector<8x64xf32>
    %382 = math.exp %381 : vector<8x64xf32>
    %383 = arith.mulf %378, %382 : vector<8x64xf32>
    %cst_179 = arith.constant 1.000000e+00 : f32
    %384 = vector.broadcast %cst_179 : f32 to vector<8x64xf32>
    %385 = arith.subf %384, %383 : vector<8x64xf32>
    %386 = arith.mulf %357, %385 : vector<8x64xf32>
    %cst_180 = arith.constant 1.000000e+00 : f32
    %387 = vector.broadcast %cst_180 : f32 to vector<8x64xf32>
    %388 = arith.addf %387, %386 : vector<8x64xf32>
    %389 = arith.mulf %350, %388 : vector<8x64xf32>
    %390 = arith.truncf %389 : vector<8x64xf32> to vector<8x64xbf16>
    %cst_181 = arith.constant dense<0.000000e+00> : vector<8x32xf32>
    %391 = tpu.matmul %390, %246, %cst_181 {dimension_numbers = #tpu.dot_dimension_numbers<[1], [0], [0], [1], [0, 0, 1, 1], [], []>} : vector<8x64xbf16>, vector<64x32xbf16>, vector<8x32xf32> -> vector<8x32xf32>
    %392 = vector.broadcast %247 : vector<1x32xf32> to vector<8x32xf32>
    %393 = arith.addf %391, %392 : vector<8x32xf32>
    %394 = arith.addf %3, %393 : vector<8x32xf32>
    %c0_182 = arith.constant 0 : index
    %c0_183 = arith.constant 0 : index
    %c0_184 = arith.constant 0 : index
    %395 = vector.load %arg17[%c0_182, %c0_183, %c0_184] : memref<1x8x32xf32, #tpu.memory_space<vmem>>, vector<1x8x32xf32>
    %396 = vector.shape_cast %395 : vector<1x8x32xf32> to vector<8x32xf32>
    %397 = vector.shape_cast %394 : vector<8x32xf32> to vector<1x8x32xf32>
    tpu.vector_store %arg17[%c0_182, %c0_183, %c0_184], %397 {strides = array<i32>} : memref<1x8x32xf32, #tpu.memory_space<vmem>>, vector<1x8x32xf32>,
    return
  }
  func.func @transform_0(%arg0: i32) -> (i32, i32, i32) {
    %c0_i32 = arith.constant 0 : i32
    %c0_i32_0 = arith.constant 0 : i32
    %c0_i32_1 = arith.constant 0 : i32
    return %arg0, %c0_i32, %c0_i32_0 : i32, i32, i32
  }
  func.func @transform_1(%arg0: i32) -> (i32, i32, i32) {
    %c0_i32 = arith.constant 0 : i32
    %c0_i32_0 = arith.constant 0 : i32
    %c0_i32_1 = arith.constant 0 : i32
    return %arg0, %c0_i32, %c0_i32_0 : i32, i32, i32
  }
  func.func @transform_2(%arg0: i32) -> (i32, i32, i32) {
    %c0_i32 = arith.constant 0 : i32
    %c0_i32_0 = arith.constant 0 : i32
    %c0_i32_1 = arith.constant 0 : i32
    %c0_i32_2 = arith.constant 0 : i32
    return %c0_i32, %c0_i32_0, %c0_i32_1 : i32, i32, i32
  }
  func.func @transform_3(%arg0: i32) -> (i32, i32, i32) {
    %c0_i32 = arith.constant 0 : i32
    %c0_i32_0 = arith.constant 0 : i32
    %c0_i32_1 = arith.constant 0 : i32
    %c0_i32_2 = arith.constant 0 : i32
    return %c0_i32, %c0_i32_0, %c0_i32_1 : i32, i32, i32
  }
  func.func @transform_4(%arg0: i32) -> (i32, i32, i32) {
    %c0_i32 = arith.constant 0 : i32
    %c0_i32_0 = arith.constant 0 : i32
    %c0_i32_1 = arith.constant 0 : i32
    %c0_i32_2 = arith.constant 0 : i32
    return %c0_i32, %c0_i32_0, %c0_i32_1 : i32, i32, i32
  }
  func.func @transform_5(%arg0: i32) -> (i32, i32, i32) {
    %c0_i32 = arith.constant 0 : i32
    %c0_i32_0 = arith.constant 0 : i32
    %c0_i32_1 = arith.constant 0 : i32
    %c0_i32_2 = arith.constant 0 : i32
    return %c0_i32, %c0_i32_0, %c0_i32_1 : i32, i32, i32
  }
  func.func @transform_6(%arg0: i32) -> (i32, i32, i32) {
    %c0_i32 = arith.constant 0 : i32
    %c0_i32_0 = arith.constant 0 : i32
    %c0_i32_1 = arith.constant 0 : i32
    %c0_i32_2 = arith.constant 0 : i32
    return %c0_i32, %c0_i32_0, %c0_i32_1 : i32, i32, i32
  }
  func.func @transform_7(%arg0: i32) -> (i32, i32) {
    %c0_i32 = arith.constant 0 : i32
    %c0_i32_0 = arith.constant 0 : i32
    %c0_i32_1 = arith.constant 0 : i32
    return %c0_i32, %c0_i32_0 : i32, i32
  }
  func.func @transform_8(%arg0: i32) -> (i32, i32) {
    %c0_i32 = arith.constant 0 : i32
    %c0_i32_0 = arith.constant 0 : i32
    %c0_i32_1 = arith.constant 0 : i32
    return %c0_i32, %c0_i32_0 : i32, i32
  }
  func.func @transform_9(%arg0: i32) -> (i32, i32) {
    %c0_i32 = arith.constant 0 : i32
    %c0_i32_0 = arith.constant 0 : i32
    %c0_i32_1 = arith.constant 0 : i32
    return %c0_i32, %c0_i32_0 : i32, i32
  }
  func.func @transform_10(%arg0: i32) -> (i32, i32) {
    %c0_i32 = arith.constant 0 : i32
    %c0_i32_0 = arith.constant 0 : i32
    %c0_i32_1 = arith.constant 0 : i32
    return %c0_i32, %c0_i32_0 : i32, i32
  }
  func.func @transform_11(%arg0: i32) -> (i32, i32) {
    %c0_i32 = arith.constant 0 : i32
    %c0_i32_0 = arith.constant 0 : i32
    %c0_i32_1 = arith.constant 0 : i32
    return %c0_i32, %c0_i32_0 : i32, i32
  }
  func.func @transform_12(%arg0: i32) -> (i32, i32) {
    %c0_i32 = arith.constant 0 : i32
    %c0_i32_0 = arith.constant 0 : i32
    %c0_i32_1 = arith.constant 0 : i32
    return %c0_i32, %c0_i32_0 : i32, i32
  }
  func.func @transform_13(%arg0: i32) -> (i32, i32) {
    %c0_i32 = arith.constant 0 : i32
    %c0_i32_0 = arith.constant 0 : i32
    %c0_i32_1 = arith.constant 0 : i32
    return %c0_i32, %c0_i32_0 : i32, i32
  }
  func.func @transform_14(%arg0: i32) -> (i32, i32) {
    %c0_i32 = arith.constant 0 : i32
    %c0_i32_0 = arith.constant 0 : i32
    %c0_i32_1 = arith.constant 0 : i32
    return %c0_i32, %c0_i32_0 : i32, i32
  }
  func.func @transform_15(%arg0: i32) -> (i32, i32, i32) {
    %c0_i32 = arith.constant 0 : i32
    %c0_i32_0 = arith.constant 0 : i32
    %c0_i32_1 = arith.constant 0 : i32
    return %arg0, %c0_i32, %c0_i32_0 : i32, i32, i32
  }
  func.func @transform_16(%arg0: i32) -> (i32, i32, i32) {
    %c0_i32 = arith.constant 0 : i32
    %c0_i32_0 = arith.constant 0 : i32
    %c0_i32_1 = arith.constant 0 : i32
    return %arg0, %c0_i32, %c0_i32_0 : i32, i32, i32
  }
}

</mosaic_0001>

<bundles_post_ra>
// kernel: tpu_custom_call.1
= control target key start
LH: loop header
LB: loop body
LE: loop exit
PB: predicated region body
PF: predicated region fallthrough
CT: control target
= control target key end

     0   :  { %s2866_s0 = inlined_call_operand.vmem [shape: f32[2,8,32], index: 0, kind: input, shape index: {}]   ;;  %s2867_s1 = inlined_call_operand.vmem [shape: f32[2,8,32], index: 1, kind: input, shape index: {}]   ;;  %s2868_s2 = inlined_call_operand.vmem [shape: bf16[4,32,8], index: 2, kind: input, shape index: {}]   ;;  %s2869_s3 = inlined_call_operand.vmem [shape: f32[4,1,8], index: 3, kind: input, shape index: {}]   ;;  %s2870_s4 = inlined_call_operand.vmem [shape: bf16[4,32,8], index: 4, kind: input, shape index: {}]   ;;  %s2871_s5 = inlined_call_operand.vmem [shape: f32[4,1,8], index: 5, kind: input, shape index: {}]   ;;  %s2872_s6 = inlined_call_operand.vmem [shape: bf16[4,8,32], index: 6, kind: input, shape index: {}]   ;;  %s2873_s7 = inlined_call_operand.vmem [shape: f32[1,32], index: 7, kind: input, shape index: {}]   ;;  %s2874_s8 = inlined_call_operand.vmem [shape: bf16[32,64], index: 8, kind: input, shape index: {}]   ;;  %s2875_s9 = inlined_call_operand.vmem [shape: bf16[32,64], index: 9, kind: input, shape index: {}]   ;;  %s2876_s10 = inlined_call_operand.vmem [shape: f32[1,64], index: 10, kind: input, shape index: {}]   ;;  %s2877_s11 = inlined_call_operand.vmem [shape: f32[1,64], index: 11, kind: input, shape index: {}]   ;;  %s2878_s12 = inlined_call_operand.vmem [shape: f32[1,64], index: 12, kind: input, shape index: {}]   ;;  %s2879_s13 = inlined_call_operand.vmem [shape: bf16[64,32], index: 13, kind: input, shape index: {}]   ;;  %s2880_s14 = inlined_call_operand.vmem [shape: f32[1,32], index: 14, kind: input, shape index: {}]   ;;  %s2881_s15 = inlined_call_operand.hbm [shape: f32[2,8,32], index: 15, kind: output, shape index: {0}]   ;;  %s2882_s16 = inlined_call_operand.hbm [shape: f32[2,8,32], index: 16, kind: output, shape index: {1}]  }
   0x1   :  { %2890 = sst [smem:[#allocation14_spill]] %s2866_s0 }
   0x2   :  { %2891 = sst [smem:[#allocation15_spill]] %s2867_s1 }
   0x3   :  { %2892 = sst [smem:[#allocation16_spill]] %s2868_s2 }
   0x4   :  { %2893 = sst [smem:[#allocation17_spill]] %s2869_s3 }
   0x5   :  { %2894 = sst [smem:[#allocation18_spill]] %s2870_s4 }
   0x6   :  { %22 = vsyncpa [#allocation3], 0 }
   0x7   :  { %24 = vsyncpa [#allocation3 + $0x1], 0 }
   0x8   :  { %25 = vsyncpa [#allocation5], 0 }
   0x9   :  { %27 = vsyncpa [#allocation5 + $0x1], 0  ;;  %s2491_s21 = smov 0   ;;  %s2493_s22 = smov 0  }
   0xa   :  { %s2495_s23 = smov 0   ;;  %s2497_s24 = smov 0  }
   0xb LB: > { %2895 = sst [smem:[#allocation8_spill]] %s2390_s21  ;;  %s2512_s25 = sadd.s32 4294967295, %s2402_s24   ;;  %s2402_s24 = sphi %s2497_s24, %s2912_s24   ;;  %s2398_s23 = sphi %s2495_s23, %s2914_s23   ;;  %s2394_s22 = sphi %s2493_s22, %s2916_s22   ;;  %s2390_s21 = sphi %s2491_s21, %s2915_s21  }
   0xc   : > { %2896 = sst [smem:[#allocation9_spill]] %s2398_s23  ;;  %s1991_s26 = sadd.s32 4294967294, %s2402_s24  }
   0xd   : > { %2897 = sst [smem:[#allocation10_spill]] %s2402_s24  ;;  %s2516_s27 = sadd.s32 1, %s2402_s24  }
   0xe   : > { %2898 = sst [smem:[#allocation11_spill]] %s2516_s27  ;;  %s365_s28 = sadd.s32 1, %s2398_s23 }
   0xf   : > { %s362_s29 = ssub.s32 %s2402_s24, %s2516_s27  ;;  %p375_p0 = scmp.ne.s32.totalorder %s2398_s23, %s2394_s22 }
  0x10   : > { %p363_p1 = scmp.eq.s32.totalorder %s362_s29, 0  ;;  %p376_p2 = scmp.eq.s32.totalorder %s2512_s25, 1 }
  0x11   : > { %p381_p3 = scmp.ne.s32.totalorder %s2394_s22, %s2390_s21  ;;  %p382_p4 = scmp.eq.s32.totalorder %s1991_s26, 1 }
  0x12   : > { %s2527_s30 = scalar_select %p363_p1, %s2398_s23, %s365_s28  }
  0x13   : > { %p2529_p5 = por %p376_p2, %p375_p0  ;;  %p2533_p6 = por %p382_p4, %p381_p3 }
  0x14   : > { %2899 = sst [smem:[#allocation12_spill]] %s2527_s30  ;;  %p1994_p7 = scmp.ge.s32.totalorder %s2402_s24, 1 }
  0x15   : > { %s2901_s17 = scalar_select %p2533_p6, 1, 0 }
  0x16   : > { %p479_p8 = scmp.lt.s32.totalorder %s2402_s24, 3 }
  0x17   : > { %2902 = sst [smem:[#allocation13_spill]] %s2901_s17 }
  0x18   : > { %p480_p9 = pnand %p1994_p7, %p479_p8 }
  0x19   : > { %s2903_s2 = sld [smem:[#allocation16_spill]] (!%p480_p9)  ;;  %p537_p10 = scmp.lt.s32.totalorder (!%p480_p9), %s2512_s25, 1 }
  0x1a   : > { %483 = sbr.rel (%p480_p9) target bundleno = 2914 (0xb62), region = 80  ;;  %s2904_s27 = sld [smem:[#allocation14_spill]] (!%p480_p9) }
  0x1b   : > { %s2905_s1 = sld [smem:[#allocation15_spill]] (!%p480_p9)  ;;  %s2806_s20 = sand.u32 (!%p480_p9), 1, %s2394_s22  }
  0x1c   : > { %s2906_s4 = sld [smem:[#allocation18_spill]] (!%p480_p9)  ;;  %s2889_s26 = sshll.u32 (!%p480_p9), %s2512_s25, 3 }
  0x1d   : > { %s2907_s3 = sld [smem:[#allocation17_spill]] (!%p480_p9) }
  0x1f   : > { %v2177_v0 = vld [vmem:[%s2903_s2 + $0x8] sm:$0xff]  ;;  %v2176_v1 = vld [vmem:[%s2903_s2] sm:$0xff]  ;;  %s538_s28 = scalar_select %p537_p10, %s2512_s25, 1  ;;  %vm577_vm0 = vcmask 261120   ;;  %v2181_v8 = vld [vmem:[%s2903_s2 + $0x18] sm:$0xff]  ;;  %vm655_vm1 = vcmask 64512  }
  0x20   : > { %587 = vmatpush.bf16.msra.mxu0 %v2177_v0  ;;  %604 = vmatpush.bf16.msra.mxu1 %v2177_v0  ;;  %v2180_v9 = vld [vmem:[%s2903_s2 + $0x10] sm:$0xff]  ;;  %v2248_v21 = vld [vmem:[%s2871_s5] ss:$0 sm:$0xff]  ;;  %vm708_vm2 = vcmask 1043456   ;;  %vm1614_vm3 = vcmask 523264  }
  0x21   : > { %s1997_s29 = sshll.u32 %s538_s28, 3  ;;  %s1995_s28 = sshll.u32 %s2806_s20, 3 }
  0x22   : > { %s2550_s17 = scalar_lea.vmem %s2904_s27, %s1997_s29  ;;  %s2555_s18 = scalar_lea.vmem %s2905_s1, %s1997_s29  ;;  %v2179_v6 = vld [vmem:[%s2906_s4 + $0x8] sm:$0xff]  ;;  %v2178_v7 = vld [vmem:[%s2906_s4] sm:$0xff] }
  0x23   : > { %v546_v2 = vld [vmem:[%s2550_s17] sm:$0xff]  ;;  %647 = vmatpush.bf16.msra.mxu3 %v2179_v6  ;;  %633 = vmatpush.bf16.msra.mxu2 %v2179_v6  ;;  %s1868_s27 = scalar_lea.hbm %s2881_s15, %s2889_s26  ;;  %s529_s30 = scalar_lea.vmem [#allocation2], %s1995_s28 }
  0x24   : > { %588 = vmatpush.bf16.msra.mxu0 %v2176_v1  ;;  %605 = vmatpush.bf16.msra.mxu1 %v2176_v1  ;;  %v547_v3 = vld [vmem:[%s2555_s18] sm:$0xff]  ;;  %v2559_v4 = vpack.c.bf16 %v546_v2, %v546_v2  ;;  %v2183_v2 = vld [vmem:[%s2906_s4 + $0x18] sm:$0xff]  ;;  %s1870_s19 = sshll.u32 %s529_s30, 4  ;;  %s1872_s1 = sshll.u32 %s1868_s27, 4  ;;  %s1871_s19 = int_to_ptr.vmem [resolvable:$true] %s1870_s19  ;;  %s1873_s1 = int_to_ptr.hbm [resolvable:$true] %s1872_s1 }
  0x25   : > { %v2561_v5 = vpack.c.bf16 %v547_v3, %v547_v3  ;;  %v2247_v10 = vld [vmem:[%s2907_s3] ss:$0 sm:$0xff]  ;;  %v2249_v37 = vld [vmem:[%s2907_s3 + $0x1] ss:$0 sm:$0xff]  ;;  %v2182_v3 = vld [vmem:[%s2906_s4 + $0x10] sm:$0xff]  ;;  %s2322_s29 = sshra.s32 %s1873_s1, 4  ;;  %s2323_s29 = int_to_ptr.hbm [resolvable:$true] %s2322_s29 }
  0x26   : > { %s2324_s21 = scalar_lea.hbm %s2323_s29, 8  ;;  %s2328_s26 = scalar_lea.hbm %s2881_s15, 16 }
  0x27   : > { %2007 = vmatmul.msk.bf16.vlgmr.msra.gmra.mxu0 %vm577_vm0, %v2559_v4  ;;  %2008 = vmatmul.msk.bf16.vlgmr.msra.gmra.mxu1 %vm577_vm0, %v2561_v5  ;;  %p2325_p11 = scmp.ne.s32.totalorder %s2323_s29, %s2324_s21  ;;  %p2329_p0 = scmp.lt.s32.totalorder %s2323_s29, %s2881_s15 }
  0x28   : > { %648 = vmatpush.bf16.msra.mxu3 %v2178_v7  ;;  %634 = vmatpush.bf16.msra.mxu2 %v2178_v7  ;;  %p2330_p1 = scmp.lt.s32.totalorder %s2328_s26, %s2324_s21 }
  0x29   : > { %p2326_p12 = pnand %p2325_p11, %p2529_p5 }
  0x2a   : > { %p2331_p2 = por %p2330_p1, %p2329_p0 }
  0x2b   : > { %2018 = vmatmul.msk.bf16.vlgmr.msra.gmra.mxu3 %vm577_vm0, %v2561_v5  ;;  %2017 = vmatmul.msk.bf16.vlgmr.msra.gmra.mxu2 %vm577_vm0, %v2559_v4  ;;  %p2327_p13 = pneg %p2326_p12 }
  0x2c   : > { %800 = vmatpush.bf16.msrb.mxu3 %v2181_v8 }
  0x2d   : > { %p2332_p3 = pnand %p2331_p2, %p2327_p13 }
  0x30   : > { %801 = vmatpush.bf16.msrb.mxu3 %v2180_v9 }
  0x3b   : > { %2041 = vmatmul.msk.bf16.vlgmr.msrb.gmra.mxu3 %vm577_vm0, %v2559_v4 }
  0xa4   : > { %v590_v11 = vpop.f32.mrf.mxu0  ;;  %v607_v12 = vpop.f32.mrf.mxu1 }
  0xa5   : > { %v608_v13 = vadd.f32 %v2247_v10, %v607_v12  ;;  %v591_v15 = vadd.f32 %v2247_v10, %v590_v11 }
  0xa7   : > { %v611_v14 = vpack.c.bf16 %v608_v13, %v608_v13  ;;  %v594_v19 = vpack.c.bf16 %v591_v15, %v591_v15 }
  0xa9   : > { %v660_v16 = vsel %vm655_vm1, %v611_v14, 0 }
  0xaa   : > { %669 = vmatpush.bf16.xpose.msrb.mxu0 %v660_v16 }
  0xac   : > { %v592_v17 = vpop.f32.mrf.mxu0  ;;  %v609_v18 = vpop.f32.mrf.mxu1 }
  0xae   : > { %v650_v20 = vpop.f32.mrf.mxu3  ;;  %v636_v58 = vpop.f32.mrf.mxu2 }
  0xaf   : > { %v651_v23 = vadd.f32 %v2248_v21, %v650_v20  ;;  %v637_v59 = vadd.f32 %v2248_v21, %v636_v58 }
  0xb1   : > { %2019 = vmatmul.msk.bf16.vlgmr.msrb.gmra.mxu0 %vm655_vm1, %v594_v19  ;;  %v654_v24 = vpack.c.bf16 %v651_v23, %v651_v23  ;;  %v640_v60 = vpack.c.bf16 %v637_v59, %v637_v59 }
  0xb2   : > { %814 = vmatpush.bf16.msra.mxu0 %v2181_v8 }
  0xb3   : > { %v710_v25 = vsel %vm708_vm2, %v654_v24, 0  ;;  %v746_v61 = vsel %vm708_vm2, %v640_v60, 0 }
  0xb4   : > { %719 = vmatpush.bf16.msrb.mxu1 %v710_v25  ;;  %755 = vmatpush.bf16.msrb.mxu2 %v746_v61 }
  0xb6   : > { %815 = vmatpush.bf16.msra.mxu0 %v2180_v9  ;;  %v652_v22 = vpop.f32.mrf.mxu3  ;;  %v638_v62 = vpop.f32.mrf.mxu2 }
  0xb8   : > { %857 = vmatpush.bf16.msra.mxu2 %v2183_v2  ;;  %843 = vmatpush.bf16.msra.mxu1 %v2183_v2 }
  0xbc   : > { %858 = vmatpush.bf16.msra.mxu2 %v2182_v3  ;;  %844 = vmatpush.bf16.msra.mxu1 %v2182_v3 }
  0xbe   : > { %v803_v26 = vpop.f32.mrf.mxu3 }
  0xbf   : > { %v804_v44 = vadd.f32 %v2249_v37, %v803_v26 }
  0xc1   : > { %2042 = vmatmul.msk.bf16.vlgmr.msra.gmra.mxu0 %vm577_vm0, %v2561_v5  ;;  %v807_v48 = vpack.c.bf16 %v804_v44, %v804_v44  ;;  %v561_v44 = vld [vmem:[%s2872_s6] sm:$0xf] }
  0xc6   : > { %v805_v28 = vpop.f32.mrf.mxu3 }
 0x12e   : > { %v2596_v27 = vpop.f32.mrf.mxu0 }
 0x12f   : > { %v675_v29 = vsel %vm655_vm1, %v2596_v27, -inf }
 0x130   : > { %v686_v30 = vrot.slane %v675_v29, 4 }
 0x132   : > { %v687_v31 = vmax.f32 %v675_v29, %v686_v30 }
 0x134   : > { %v688_v32 = vrot.slane %v687_v31, 2 }
 0x136   : > { %v689_v33 = vmax.f32 %v687_v31, %v688_v32  ;;  %v673_v34 = vpop.f32.mrf.mxu0 }
 0x138   : > { %v690_v35 = vrot.slane %v689_v33, 1 }
 0x13a   : > { %v691_v36 = vmax.f32 %v689_v33, %v690_v35 }
 0x13c   : > { %v692_v38 = vsub.f32 %v2596_v27, %v691_v36 }
 0x13e   : > { %v693_v39 = vmul.f32 1.442695, %v692_v38  ;;  %v817_v40 = vpop.f32.mrf.mxu0  ;;  %v2250_v38 = vld [vmem:[%s2871_s5 + $0x1] ss:$0 sm:$0xff] }
 0x13f   : > { %v818_v41 = vadd.f32 %v2249_v37, %v817_v40 }
 0x140   : > { %2260 = vpow2.f32 %v693_v39 }
 0x141   : > { %v821_v42 = vpack.c.bf16 %v818_v41, %v818_v41 }
 0x143   : > { %v869_v43 = vsel %vm655_vm1, %v821_v42, 0 }
 0x144   : > { %878 = vmatpush.bf16.xpose.msra.mxu3 %v869_v43 }
 0x146   : > { %v2261_v45 = vpop.eup %2260  ;;  %v819_v46 = vpop.f32.mrf.mxu0 }
 0x147   : > { %v695_v47 = vsel %vm655_vm1, %v2261_v45, 0.0 }
 0x148   : > { %v696_v49 = vrot.slane %v695_v47, 4 }
 0x14a   : > { %v697_v50 = vadd.f32 %v696_v49, %v695_v47 }
 0x14b   : > { %2053 = vmatmul.msk.bf16.vlgmr.msra.gmra.mxu3 %vm655_vm1, %v807_v48 }
 0x14c   : > { %v698_v51 = vrot.slane %v697_v50, 2 }
 0x14e   : > { %v699_v52 = vadd.f32 %v698_v51, %v697_v50 }
 0x150   : > { %v700_v53 = vrot.slane %v699_v52, 1 }
 0x152   : > { %v701_v54 = vadd.f32 %v700_v53, %v699_v52 }
 0x154   : > { %2262 = vrcp.f32 %v701_v54  ;;  %v2032_v54 = vld [vmem:[%s2872_s6 + $0x4] sm:$0xf] }
 0x15a   : > { %v2263_v55 = vpop.eup %2262 }
 0x15b   : > { %v703_v56 = vmul.f32 %v2263_v55, %v2261_v45  ;;  %v993_v45 = vsel %vm708_vm2, %v561_v44, 0  ;;  %v974_v55 = vsel %vm708_vm2, %v2032_v54, 0 }
 0x15c   : > { %1002 = vmatpush.bf16.msrb.mxu3 %v993_v45 }
 0x15d   : > { %v725_v57 = vpack.c.bf16 %v703_v56, %v703_v56  ;;  %v2185_v56 = vld [vmem:[%s2903_s2 + $0x28] sm:$0xff] }
 0x15f   : > { %726 = vxpose.xlu0.c.b16.start.end [1/1] (short) (narrow) %v725_v57, 16  ;;  %v2184_v57 = vld [vmem:[%s2903_s2 + $0x20] sm:$0xff] }
 0x160   : > { %1092 = vmatpush.bf16.msra.mxu3 %v2185_v56 }
 0x164   : > { %1093 = vmatpush.bf16.msra.mxu3 %v2184_v57 }
 0x1ce   : > { %v880_v63 = vpop.f32.mrf.mxu3 }
 0x1cf   : > { %v884_v0 = vsel %vm655_vm1, %v880_v63, -inf }
 0x1d0   : > { %676 = vmax.xlane.f32.xlu0 %v675_v29  ;;  %885 = vmax.xlane.f32.xlu1 %v884_v0  ;;  %v895_v7 = vrot.slane %v884_v0, 4 }
 0x1d2   : > { %v896_v8 = vmax.f32 %v884_v0, %v895_v7 }
 0x1d4   : > { %v897_v9 = vrot.slane %v896_v8, 2 }
 0x1d6   : > { %v882_v1 = vpop.f32.mrf.mxu3  ;;  %v898_v10 = vmax.f32 %v896_v8, %v897_v9 }
 0x1d8   : > { %v899_v11 = vrot.slane %v898_v10, 1 }
 0x1da   : > { %v900_v12 = vmax.f32 %v898_v10, %v899_v11 }
 0x1dc   : > { %v901_v13 = vsub.f32 %v880_v63, %v900_v12 }
 0x1de   : > { %v902_v16 = vmul.f32 1.442695, %v901_v13 }
 0x1e0   : > { %2264 = vpow2.f32 %v902_v16 }
 0x1e6   : > { %v2265_v21 = vpop.eup %2264 }
 0x1e7   : > { %v904_v26 = vsel %vm655_vm1, %v2265_v21, 0.0 }
 0x1e8   : > { %v905_v28 = vrot.slane %v904_v26, 4 }
 0x1ea   : > { %v906_v29 = vadd.f32 %v905_v28, %v904_v26 }
 0x20b   : > { %v734_v6 = vpop.trf.xlu0 }
 0x20c   : > { %2021 = vmatmul.msk.bf16.vlgmr.msrb.gmra.mxu2 %vm655_vm1, %v734_v6 }
 0x20d   : > { %983 = vmatpush.bf16.msrb.mxu2 %v974_v55 }
 0x21c   : > { %2052 = vmatmul.msk.bf16.vlgmr.msra.gmra.mxu2 %vm577_vm0, %v2561_v5 }
 0x21d   : > { %1078 = vmatpush.bf16.msra.mxu2 %v2185_v56 }
 0x221   : > { %1079 = vmatpush.bf16.msra.mxu2 %v2184_v57 }
 0x243   : > { %v677_v14 = vpop.xlane.xlu0 %676  ;;  %v886_v15 = vpop.xlane.xlu1 %885 }
 0x244   : > { %v678_v17 = vsub.f32 %v2596_v27, %v677_v14  ;;  %v887_v18 = vsub.f32 %v880_v63, %v886_v15  ;;  %v907_v27 = vrot.slane %v906_v29, 2  ;;  %v2251_v14 = vld [vmem:[%s2907_s3 + $0x2] ss:$0 sm:$0xff] }
 0x246   : > { %v679_v19 = vmul.f32 1.442695, %v678_v17  ;;  %v888_v20 = vmul.f32 1.442695, %v887_v18  ;;  %v908_v30 = vadd.f32 %v907_v27, %v906_v29  ;;  %v2187_v27 = vld [vmem:[%s2906_s4 + $0x28] sm:$0xff] }
 0x248   : > { %2266 = vpow2.f32 %v679_v19  ;;  %v909_v31 = vrot.slane %v908_v30, 1 }
 0x249   : > { %2268 = vpow2.f32 %v888_v20 }
 0x24a   : > { %v910_v32 = vadd.f32 %v909_v31, %v908_v30 }
 0x24c   : > { %2270 = vrcp.f32 %v910_v32 }
 0x24e   : > { %v2267_v22 = vpop.eup %2266 }
 0x24f   : > { %v2269_v23 = vpop.eup %2268  ;;  %v681_v24 = vsel %vm655_vm1, %v2267_v22, 0.0 }
 0x250   : > { %682 = vadd.xlane.f32.xlu1 %v681_v24  ;;  %v890_v25 = vsel %vm655_vm1, %v2269_v23, 0.0 }
 0x251   : > { %891 = vadd.xlane.f32.xlu2 %v890_v25 }
 0x252   : > { %v2271_v33 = vpop.eup %2270 }
 0x253   : > { %v912_v34 = vmul.f32 %v2271_v33, %v2265_v21 }
 0x255   : > { %v933_v35 = vpack.c.bf16 %v912_v34, %v912_v34 }
 0x27a   : > { %934 = vxpose.xlu2.c.b16.start.end [1/1] (short) (narrow) %v933_v35, 16  ;;  %v2186_v35 = vld [vmem:[%s2906_s4 + $0x20] sm:$0xff] }
 0x28f   : > { %v757_v36 = vpop.f32.mrf.mxu2 }
 0x290   : > { %v762_v8 = vpack.c.bf16 %v757_v36, %v757_v36 }
 0x297   : > { %v759_v37 = vpop.f32.mrf.mxu2 }
 0x29f   : > { %v860_v39 = vpop.f32.mrf.mxu2 }
 0x2a0   : > { %v861_v40 = vadd.f32 %v2250_v38, %v860_v39 }
 0x2a2   : > { %v864_v41 = vpack.c.bf16 %v861_v40, %v861_v40 }
 0x2a4   : > { %v918_v42 = vsel %vm708_vm2, %v864_v41, 0 }
 0x2a5   : > { %927 = vmatpush.bf16.msrb.mxu0 %v918_v42 }
 0x2a7   : > { %v862_v43 = vpop.f32.mrf.mxu2 }
 0x2a9   : > { %1019 = vmatpush.bf16.msra.mxu0 %v974_v55 }
 0x2c3   : > { %v683_v46 = vpop.xlane.xlu1 %682 }
 0x2c4   : > { %v892_v47 = vpop.xlane.xlu2 %891  ;;  %2272 = vrcp.f32 %v683_v46 }
 0x2c5   : > { %2274 = vrcp.f32 %v892_v47 }
 0x2ca   : > { %v2273_v48 = vpop.eup %2272 }
 0x2cb   : > { %v2275_v49 = vpop.eup %2274  ;;  %v685_v50 = vmul.f32 %v2273_v48, %v2267_v22 }
 0x2cc   : > { %v894_v51 = vmul.f32 %v2275_v49, %v2269_v23 }
 0x2cd   : > { %v704_v52 = vpack.c.bf16 %v685_v50, %v685_v50 }
 0x2ce   : > { %v913_v53 = vpack.c.bf16 %v894_v51, %v894_v51 }
 0x2cf   : > { %2020 = vmatmul.msk.bf16.vlgmr.msrb.gmra.mxu1 %vm655_vm1, %v704_v52 }
 0x2d0   : > { %2054 = vmatmul.msk.bf16.vlgmr.msrb.gmra.mxu0 %vm655_vm1, %v913_v53 }
 0x2d1   : > { %1121 = vmatpush.bf16.msrb.mxu0 %v2187_v27 }
 0x2d5   : > { %1122 = vmatpush.bf16.msrb.mxu0 %v2186_v35 }
 0x2df   : > { %2051 = vmatmul.msk.bf16.vlgmr.msra.gmra.mxu1 %vm577_vm0, %v2559_v4 }
 0x31b   : > { %v942_v6 = vpop.trf.xlu2 }
 0x34c   : > { %v721_v58 = vpop.f32.mrf.mxu1 }
 0x34d   : > { %v761_v59 = vpack.c.bf16 %v721_v58, %v721_v58  ;;  %v929_v60 = vpop.f32.mrf.mxu0 }
 0x34e   : > { %v969_v61 = vpack.c.bf16 %v929_v60, %v929_v60  ;;  %v2252_v60 = vld [vmem:[%s2871_s5 + $0x2] ss:$0 sm:$0xff] }
 0x34f   : > { %2057 = vmatmul.msk.bf16.vlgmr.msrb.gmra.mxu3 %vm655_vm1, %v761_v59 }
 0x350   : > { %2056 = vmatmul.msk.bf16.vlgmr.msrb.gmra.mxu2 %vm655_vm1, %v969_v61 }
 0x354   : > { %v723_v62 = vpop.f32.mrf.mxu1 }
 0x355   : > { %v931_v63 = vpop.f32.mrf.mxu0 }
 0x35c   : > { %v846_v0 = vpop.f32.mrf.mxu1 }
 0x35d   : > { %v847_v1 = vadd.f32 %v2250_v38, %v846_v0 }
 0x35f   : > { %v850_v2 = vpack.c.bf16 %v847_v1, %v847_v1  ;;  %2080 = vmatmul.msk.bf16.vlgmr.msra.gmra.mxu3 %vm577_vm0, %v2561_v5 }
 0x360   : > { %2079 = vmatmul.msk.bf16.vlgmr.msra.gmra.mxu2 %vm577_vm0, %v2559_v4 }
 0x361   : > { %v954_v3 = vsel %vm708_vm2, %v850_v2, 0 }
 0x362   : > { %963 = vmatpush.bf16.msrb.mxu1 %v954_v3 }
 0x364   : > { %v848_v7 = vpop.f32.mrf.mxu1 }
 0x365   : > { %2055 = vmatmul.msk.bf16.vlgmr.msrb.gmra.mxu1 %vm655_vm1, %v942_v6 }
 0x366   : > { %1035 = vmatpush.bf16.msra.mxu1 %v993_v45 }
 0x36a   : > { %1135 = vmatpush.bf16.msrb.mxu1 %v2187_v27 }
 0x36e   : > { %1136 = vmatpush.bf16.msrb.mxu1 %v2186_v35 }
 0x375   : > { %2059 = vmatmul.msk.bf16.vlgmr.msra.gmra.mxu1 %vm655_vm1, %v762_v8 }
 0x385   : > { %2090 = vmatmul.msk.bf16.vlgmr.msrb.gmra.mxu1 %vm577_vm0, %v2561_v5 }
 0x3d2   : > { %v1004_v9 = vpop.f32.mrf.mxu3 }
 0x3d3   : > { %v985_v10 = vpop.f32.mrf.mxu2 }
 0x3d4   : > { %v2653_v11 = vadd.f32 %v1004_v9, %v985_v10 }
 0x3da   : > { %v1006_v12 = vpop.f32.mrf.mxu3 }
 0x3db   : > { %v987_v13 = vpop.f32.mrf.mxu2 }
 0x3e2   : > { %v965_v15 = vpop.f32.mrf.mxu1  ;;  %v1095_v16 = vpop.f32.mrf.mxu3 }
 0x3e3   : > { %v1008_v17 = vpack.c.bf16 %v965_v15, %v965_v15  ;;  %v1081_v18 = vpop.f32.mrf.mxu2  ;;  %v1096_v19 = vadd.f32 %v2251_v14, %v1095_v16  ;;  %v2188_v15 = vld [vmem:[%s2903_s2 + $0x30] sm:$0xff]  ;;  %v2070_v16 = vld [vmem:[%s2872_s6 + $0x8] sm:$0xf] }
 0x3e4   : > { %v1082_v21 = vadd.f32 %v2251_v14, %v1081_v18  ;;  %v2189_v14 = vld [vmem:[%s2903_s2 + $0x38] sm:$0xff]  ;;  %s1853_s2 = scalar_lea.sflag [#allocation3], %s2806_s20 }
 0x3e5   : > { %v1099_v20 = vpack.c.bf16 %v1096_v19, %v1096_v19  ;;  %2058 = vmatmul.msk.bf16.vlgmr.msra.gmra.mxu0 %vm655_vm1, %v1008_v17  ;;  %v1252_v17 = vsel %vm708_vm2, %v2070_v16, 0 }
 0x3e6   : > { %v1085_v25 = vpack.c.bf16 %v1082_v21, %v1082_v21  ;;  %1261 = vmatpush.bf16.msra.mxu1 %v1252_v17 }
 0x3e7   : > { %v1147_v22 = vsel %vm655_vm1, %v1099_v20, 0 }
 0x3e8   : > { %1156 = vmatpush.bf16.xpose.msrb.mxu2 %v1147_v22 }
 0x3ea   : > { %v967_v23 = vpop.f32.mrf.mxu1  ;;  %v1097_v24 = vpop.f32.mrf.mxu3 }
 0x3eb   : > { %v1083_v26 = vpop.f32.mrf.mxu2 }
 0x3ef   : > { %2091 = vmatmul.msk.bf16.vlgmr.msrb.gmra.mxu2 %vm655_vm1, %v1085_v25 }
 0x3f0   : > { %1279 = vmatpush.bf16.msra.mxu2 %v1252_v17 }
 0x3f2   : > { %v2661_v28 = vpop.f32.mrf.mxu1 }
 0x3f5   : > { %2089 = vmatmul.msk.bf16.vlgmr.msrb.gmra.mxu0 %vm577_vm0, %v2559_v4 }
 0x3fa   : > { %v1039_v29 = vpop.f32.mrf.mxu1 }
 0x3fb   : > { %v2253_v29 = vld [vmem:[%s2907_s3 + $0x3] ss:$0 sm:$0xff] }
 0x402   : > { %v1138_v61 = vpop.f32.mrf.mxu1 }
 0x403   : > { %v1139_v62 = vadd.f32 %v2252_v60, %v1138_v61 }
 0x405   : > { %v1142_v63 = vpack.c.bf16 %v1139_v62, %v1139_v62 }
 0x407   : > { %v1196_v0 = vsel %vm708_vm2, %v1142_v63, 0 }
 0x408   : > { %1205 = vmatpush.bf16.msrb.mxu3 %v1196_v0 }
 0x40a   : > { %v1140_v2 = vpop.f32.mrf.mxu1 }
 0x40c   : > { %1323 = vmatpush.bf16.msra.mxu3 %v2189_v14 }
 0x410   : > { %1324 = vmatpush.bf16.msra.mxu3 %v2188_v15 }
 0x462   : > { %v2666_v30 = vpop.f32.mrf.mxu0 }
 0x46a   : > { %v1023_v31 = vpop.f32.mrf.mxu0 }
 0x472   : > { %v1158_v32 = vpop.f32.mrf.mxu2  ;;  %v1124_v1 = vpop.f32.mrf.mxu0 }
 0x473   : > { %v1162_v33 = vsel %vm655_vm1, %v1158_v32, -inf  ;;  %v1125_v3 = vadd.f32 %v2252_v60, %v1124_v1 }
 0x474   : > { %1163 = vmax.xlane.f32.xlu1 %v1162_v33  ;;  %v1173_v36 = vrot.slane %v1162_v33, 4 }
 0x475   : > { %v1128_v6 = vpack.c.bf16 %v1125_v3, %v1125_v3 }
 0x476   : > { %v1174_v37 = vmax.f32 %v1162_v33, %v1173_v36 }
 0x477   : > { %v1232_v7 = vsel %vm708_vm2, %v1128_v6, 0 }
 0x478   : > { %v1175_v38 = vrot.slane %v1174_v37, 2  ;;  %1241 = vmatpush.bf16.msra.mxu0 %v1232_v7 }
 0x47a   : > { %v1160_v34 = vpop.f32.mrf.mxu2  ;;  %v1176_v39 = vmax.f32 %v1174_v37, %v1175_v38  ;;  %v1126_v8 = vpop.f32.mrf.mxu0 }
 0x47b   : > { %v2254_v8 = vld [vmem:[%s2871_s5 + $0x3] ss:$0 sm:$0xff] }
 0x47c   : > { %v1177_v43 = vrot.slane %v1176_v39, 1  ;;  %1337 = vmatpush.bf16.msrb.mxu0 %v2189_v14 }
 0x47e   : > { %v1178_v44 = vmax.f32 %v1176_v39, %v1177_v43 }
 0x480   : > { %v1179_v47 = vsub.f32 %v1158_v32, %v1178_v44  ;;  %1338 = vmatpush.bf16.msrb.mxu0 %v2188_v15 }
 0x482   : > { %v1180_v48 = vmul.f32 1.442695, %v1179_v47 }
 0x4e7   : > { %v1164_v40 = vpop.xlane.xlu1 %1163 }
 0x4e8   : > { %v1165_v41 = vsub.f32 %v1158_v32, %v1164_v40  ;;  %v1038_v40 = vadd.f32 %v2661_v28, %v2666_v30  ;;  %v2191_v28 = vld [vmem:[%s2906_s4 + $0x38] sm:$0xff]  ;;  %v2190_v30 = vld [vmem:[%s2906_s4 + $0x30] sm:$0xff] }
 0x4e9   : > { %1366 = vmatpush.bf16.msrb.mxu1 %v2191_v28  ;;  %1380 = vmatpush.bf16.msrb.mxu2 %v2191_v28  ;;  %v2256_v28 = vld [vmem:[%s2876_s10] ss:$0 sm:$0xff] }
 0x4ea   : > { %v1166_v42 = vmul.f32 1.442695, %v1165_v41 }
 0x4ec   : > { %2276 = vpow2.f32 %v1166_v42 }
 0x4ed   : > { %2278 = vpow2.f32 %v1180_v48  ;;  %1367 = vmatpush.bf16.msrb.mxu1 %v2190_v30  ;;  %1381 = vmatpush.bf16.msrb.mxu2 %v2190_v30 }
 0x4f2   : > { %v2277_v45 = vpop.eup %2276 }
 0x4f3   : > { %v1168_v46 = vsel %vm655_vm1, %v2277_v45, 0.0  ;;  %v2279_v49 = vpop.eup %2278 }
 0x4f4   : > { %1169 = vadd.xlane.f32.xlu1 %v1168_v46  ;;  %v1182_v50 = vsel %vm655_vm1, %v2279_v49, 0.0 }
 0x4f5   : > { %v1183_v51 = vrot.slane %v1182_v50, 4 }
 0x4f7   : > { %v1184_v52 = vadd.f32 %v1183_v51, %v1182_v50 }
 0x4f9   : > { %v1185_v53 = vrot.slane %v1184_v52, 2 }
 0x4fb   : > { %v1186_v54 = vadd.f32 %v1185_v53, %v1184_v52 }
 0x4fd   : > { %v1187_v55 = vrot.slane %v1186_v54, 1 }
 0x4ff   : > { %v1188_v56 = vadd.f32 %v1187_v55, %v1186_v54 }
 0x501   : > { %2280 = vrcp.f32 %v1188_v56 }
 0x507   : > { %v2281_v57 = vpop.eup %2280 }
 0x508   : > { %v1190_v58 = vmul.f32 %v2281_v57, %v2279_v49 }
 0x50a   : > { %v1211_v59 = vpack.c.bf16 %v1190_v58, %v1190_v58 }
 0x52e   : > { %1212 = vxpose.xlu1.c.b16.start.end [1/1] (short) (narrow) %v1211_v59, 16 }
 0x567   : > { %v1170_v9 = vpop.xlane.xlu1 %1169 }
 0x568   : > { %2282 = vrcp.f32 %v1170_v9 }
 0x56e   : > { %v2283_v10 = vpop.eup %2282 }
 0x56f   : > { %v1172_v12 = vmul.f32 %v2283_v10, %v2277_v45 }
 0x571   : > { %v1191_v13 = vpack.c.bf16 %v1172_v12, %v1172_v12 }
 0x573   : > { %2092 = vmatmul.msk.bf16.vlgmr.msrb.gmra.mxu3 %vm655_vm1, %v1191_v13 }
 0x583   : > { %2115 = vmatmul.msk.bf16.vlgmr.msra.gmra.mxu3 %vm577_vm0, %v2559_v4 }
 0x5da   : > { %v1220_v18 = vpop.trf.xlu1 }
 0x5db   : > { %2093 = vmatmul.msk.bf16.vlgmr.msra.gmra.mxu0 %vm655_vm1, %v1220_v18 }
 0x5eb   : > { %2116 = vmatmul.msk.bf16.vlgmr.msrb.gmra.mxu0 %vm577_vm0, %v2561_v5 }
 0x5f6   : > { %v1207_v19 = vpop.f32.mrf.mxu3 }
 0x5f7   : > { %v1247_v20 = vpack.c.bf16 %v1207_v19, %v1207_v19 }
 0x5f9   : > { %2094 = vmatmul.msk.bf16.vlgmr.msra.gmra.mxu1 %vm655_vm1, %v1247_v20 }
 0x5fe   : > { %v1209_v21 = vpop.f32.mrf.mxu3 }
 0x606   : > { %v1326_v22 = vpop.f32.mrf.mxu3 }
 0x607   : > { %v1327_v34 = vadd.f32 %v2253_v29, %v1326_v22 }
 0x609   : > { %v1330_v36 = vpack.c.bf16 %v1327_v34, %v1327_v34  ;;  %2125 = vmatmul.msk.bf16.vlgmr.msrb.gmra.mxu1 %vm577_vm0, %v2559_v4 }
 0x60e   : > { %v1328_v23 = vpop.f32.mrf.mxu3 }
 0x658   : > { %v1243_v24 = vpop.f32.mrf.mxu0 }
 0x659   : > { %v1268_v25 = vpack.c.bf16 %v1243_v24, %v1243_v24 }
 0x65b   : > { %2095 = vmatmul.msk.bf16.vlgmr.msra.gmra.mxu2 %vm655_vm1, %v1268_v25  ;;  %v2106_v25 = vld [vmem:[%s2872_s6 + $0xc] sm:$0xf] }
 0x660   : > { %v1245_v26 = vpop.f32.mrf.mxu0 }
 0x661   : > { %v1497_v26 = vsel %vm708_vm2, %v2106_v25, 0 }
 0x662   : > { %1506 = vmatpush.bf16.msra.mxu2 %v1497_v26 }
 0x668   : > { %v1340_v27 = vpop.f32.mrf.mxu0 }
 0x669   : > { %v1341_v31 = vadd.f32 %v2253_v29, %v1340_v27 }
 0x66b   : > { %v1344_v32 = vpack.c.bf16 %v1341_v31, %v1341_v31  ;;  %2126 = vmatmul.msk.bf16.vlgmr.msrb.gmra.mxu2 %vm577_vm0, %v2561_v5 }
 0x66d   : > { %v1392_v33 = vsel %vm655_vm1, %v1344_v32, 0 }
 0x66e   : > { %1401 = vmatpush.bf16.xpose.msrb.mxu3 %v1392_v33 }
 0x670   : > { %v1342_v35 = vpop.f32.mrf.mxu0 }
 0x671   : > { %v2195_v35 = vld [vmem:[%s2875_s9 + $0x8] sm:$0xff] }
 0x675   : > { %2127 = vmatmul.msk.bf16.vlgmr.msrb.gmra.mxu3 %vm655_vm1, %v1330_v36  ;;  %v2194_v36 = vld [vmem:[%s2875_s9] sm:$0xff] }
 0x676   : > { %v1263_v37 = vpop.f32.mrf.mxu1  ;;  %1524 = vmatpush.bf16.msra.mxu3 %v1497_v26 }
 0x677   : > { %v2707_v38 = vadd.f32 %v1263_v37, %v2653_v11  ;;  %v2255_v37 = vld [vmem:[%s2873_s7] ss:$0 sm:$0xff] }
 0x67a   : > { %1748 = vmatpush.bf16.msrb.mxu3 %v2195_v35 }
 0x67e   : > { %v1265_v39 = vpop.f32.mrf.mxu1  ;;  %1749 = vmatpush.bf16.msrb.mxu3 %v2194_v36 }
 0x686   : > { %v1369_v9 = vpop.f32.mrf.mxu1 }
 0x687   : > { %v1370_v10 = vadd.f32 %v2254_v8, %v1369_v9 }
 0x689   : > { %v1373_v12 = vpack.c.bf16 %v1370_v10, %v1370_v10 }
 0x68b   : > { %v1477_v13 = vsel %vm708_vm2, %v1373_v12, 0 }
 0x68c   : > { %1486 = vmatpush.bf16.msra.mxu1 %v1477_v13 }
 0x68e   : > { %v1371_v14 = vpop.f32.mrf.mxu1 }
 0x6de   : > { %v1281_v41 = vpop.f32.mrf.mxu2 }
 0x6df   : > { %v2711_v42 = vadd.f32 %v1281_v41, %v1038_v40  ;;  %v2193_v41 = vld [vmem:[%s2874_s8 + $0x8] sm:$0xff] }
 0x6e0   : > { %1603 = vmatpush.bf16.msrb.mxu1 %v2193_v41 }
 0x6e6   : > { %v1283_v43 = vpop.f32.mrf.mxu2 }
 0x6ee   : > { %v1383_v15 = vpop.f32.mrf.mxu2 }
 0x6ef   : > { %v1384_v16 = vadd.f32 %v2254_v8, %v1383_v15 }
 0x6f1   : > { %v1387_v17 = vpack.c.bf16 %v1384_v16, %v1384_v16 }
 0x6f3   : > { %v1441_v18 = vsel %vm708_vm2, %v1387_v17, 0 }
 0x6f4   : > { %1450 = vmatpush.bf16.msra.mxu0 %v1441_v18 }
 0x6f6   : > { %v1385_v19 = vpop.f32.mrf.mxu2 }
 0x6f8   : > { %v1403_v44 = vpop.f32.mrf.mxu3  ;;  %1578 = vmatpush.bf16.msrb.mxu0 %v2195_v35 }
 0x6f9   : > { %v1407_v45 = vsel %vm655_vm1, %v1403_v44, -inf }
 0x6fa   : > { %1408 = vmax.xlane.f32.xlu2 %v1407_v45  ;;  %v1418_v46 = vrot.slane %v1407_v45, 4 }
 0x6fc   : > { %v1419_v47 = vmax.f32 %v1407_v45, %v1418_v46  ;;  %1579 = vmatpush.bf16.msrb.mxu0 %v2194_v36  ;;  %v2192_v45 = vld [vmem:[%s2874_s8] sm:$0xff] }
 0x6fd   : > { %1604 = vmatpush.bf16.msrb.mxu1 %v2192_v45 }
 0x6fe   : > { %v1420_v48 = vrot.slane %v1419_v47, 2 }
 0x700   : > { %v1421_v49 = vmax.f32 %v1419_v47, %v1420_v48  ;;  %v1405_v50 = vpop.f32.mrf.mxu3 }
 0x702   : > { %v1422_v51 = vrot.slane %v1421_v49, 1 }
 0x704   : > { %v1423_v11 = vmax.f32 %v1421_v49, %v1422_v51 }
 0x706   : > { %v1424_v52 = vsub.f32 %v1403_v44, %v1423_v11 }
 0x708   : > { %v1425_v53 = vmul.f32 1.442695, %v1424_v52 }
 0x70a   : > { %2284 = vpow2.f32 %v1425_v53 }
 0x710   : > { %v2285_v54 = vpop.eup %2284 }
 0x711   : > { %v1427_v55 = vsel %vm655_vm1, %v2285_v54, 0.0 }
 0x712   : > { %v1428_v56 = vrot.slane %v1427_v55, 4 }
 0x714   : > { %v1429_v57 = vadd.f32 %v1428_v56, %v1427_v55 }
 0x716   : > { %v1430_v58 = vrot.slane %v1429_v57, 2 }
 0x718   : > { %v1431_v59 = vadd.f32 %v1430_v58, %v1429_v57 }
 0x71a   : > { %v1432_v60 = vrot.slane %v1431_v59, 1 }
 0x71c   : > { %v1433_v61 = vadd.f32 %v1432_v60, %v1431_v59  ;;  %v2404_v60 = vmov 64.0  }
 0x71e   : > { %2286 = vrcp.f32 %v1433_v61 }
 0x724   : > { %v2287_v62 = vpop.eup %2286 }
 0x725   : > { %v1435_v63 = vmul.f32 %v2287_v62, %v2285_v54 }
 0x727   : > { %v1456_v0 = vpack.c.bf16 %v1435_v63, %v1435_v63 }
 0x729   : > { %1457 = vxpose.xlu0.c.b16.start.end [1/1] (short) (narrow) %v1456_v0, 16 }
 0x76d   : > { %v1409_v1 = vpop.xlane.xlu2 %1408 }
 0x76e   : > { %v1410_v2 = vsub.f32 %v1403_v44, %v1409_v1 }
 0x770   : > { %v1411_v3 = vmul.f32 1.442695, %v1410_v2 }
 0x772   : > { %2288 = vpow2.f32 %v1411_v3 }
 0x778   : > { %v2289_v6 = vpop.eup %2288 }
 0x779   : > { %v1413_v7 = vsel %vm655_vm1, %v2289_v6, 0.0 }
 0x77a   : > { %1414 = vadd.xlane.f32.xlu1 %v1413_v7 }
 0x7d5   : > { %v1465_v20 = vpop.trf.xlu0 }
 0x7d6   : > { %2129 = vmatmul.msk.bf16.vlgmr.msra.gmra.mxu1 %vm655_vm1, %v1465_v20 }
 0x7e6   : > { %2149 = vmatmul.msk.bf16.vlgmr.msrb.gmra.mxu1 %vm577_vm0, %v2559_v4 }
 0x7ed   : > { %v1415_v21 = vpop.xlane.xlu1 %1414 }
 0x7ee   : > { %2290 = vrcp.f32 %v1415_v21 }
 0x7ef   : > { %2292 = vrcp.f32 %v2404_v60 }
 0x7f4   : > { %v2291_v22 = vpop.eup %2290 }
 0x7f5   : > { %v1417_v23 = vmul.f32 %v2291_v22, %v2289_v6  ;;  %v2293_v61 = vpop.eup %2292 }
 0x7f6   : > { %v1619_v62 = vmul.f32 64.0, %v2293_v61  ;;  %vm1623_vm4 = vweird.f32 %v2293_v61 }
 0x7f7   : > { %v1436_v24 = vpack.c.bf16 %v1417_v23, %v1417_v23 }
 0x7f8   : > { %v1620_v63 = vsub.f32 1.0, %v1619_v62 }
 0x7f9   : > { %2128 = vmatmul.msk.bf16.vlgmr.msra.gmra.mxu0 %vm655_vm1, %v1436_v24 }
 0x7fa   : > { %1761 = vmatpush.bf16.msra.mxu0 %v2193_v41  ;;  %v1621_v0 = vmul.f32 %v2293_v61, %v1620_v63  ;;  %v2199_v41 = vld [vmem:[%s2879_s13 + $0x18] sm:$0xff] }
 0x7fb   : > { %1727 = vmatpush.bf16.msrb.mxu2 %v2199_v41  ;;  %1841 = vmatpush.bf16.msra.mxu1 %v2199_v41 }
 0x7fc   : > { %v1622_v1 = vadd.f32 %v2293_v61, %v1621_v0 }
 0x7fe   : > { %1762 = vmatpush.bf16.msra.mxu0 %v2192_v45  ;;  %v1624_v2 = vsel %vm1623_vm4, %v2293_v61, %v1622_v1  ;;  %v2198_v45 = vld [vmem:[%s2879_s13 + $0x10] sm:$0xff] }
 0x7ff   : > { %1728 = vmatpush.bf16.msrb.mxu2 %v2198_v45  ;;  %1842 = vmatpush.bf16.msra.mxu1 %v2198_v45 }
 0x853   : > { %v1488_v29 = vpop.f32.mrf.mxu1 }
 0x854   : > { %v1513_v27 = vpack.c.bf16 %v1488_v29, %v1488_v29 }
 0x856   : > { %2131 = vmatmul.msk.bf16.vlgmr.msra.gmra.mxu3 %vm655_vm1, %v1513_v27  ;;  %v2257_v27 = vld [vmem:[%s2877_s11] ss:$0 sm:$0xff] }
 0x85b   : > { %v1490_v31 = vpop.f32.mrf.mxu1 }
 0x863   : > { %v1606_v51 = vpop.f32.mrf.mxu1 }
 0x86b   : > { %v1608_v52 = vpop.f32.mrf.mxu1 }
 0x876   : > { %v1452_v32 = vpop.f32.mrf.mxu0 }
 0x877   : > { %v1492_v33 = vpack.c.bf16 %v1452_v32, %v1452_v32  ;;  %v2258_v32 = vld [vmem:[%s2878_s12] ss:$0 sm:$0xff] }
 0x879   : > { %2130 = vmatmul.msk.bf16.vlgmr.msra.gmra.mxu2 %vm655_vm1, %v1492_v33 }
 0x87e   : > { %v1454_v34 = vpop.f32.mrf.mxu0 }
 0x8d9   : > { %v1526_v39 = vpop.f32.mrf.mxu3 }
 0x8da   : > { %v1530_v40 = vadd.f32 %v1526_v39, %v2711_v42 }
 0x8dc   : > { %v1535_v43 = vadd.f32 %v2255_v37, %v1530_v40 }
 0x8de   : > { %v1738_v44 = vpack.c.bf16 %v1535_v43, %v1535_v43 }
 0x8e0   : > { %2167 = vmatmul.msk.bf16.vlgmr.msrb.gmra.mxu3 %vm577_vm0, %v1738_v44 }
 0x8e1   : > { %v1528_v46 = vpop.f32.mrf.mxu3 }
 0x8fc   : > { %v1508_v42 = vpop.f32.mrf.mxu2 }
 0x8fd   : > { %v1512_v47 = vadd.f32 %v1508_v42, %v2707_v38 }
 0x8ff   : > { %v1534_v48 = vadd.f32 %v2255_v37, %v1512_v47 }
 0x901   : > { %v1556_v49 = vpack.c.bf16 %v1534_v48, %v1534_v48 }
 0x903   : > { %2140 = vmatmul.msk.bf16.vlgmr.msrb.gmra.mxu0 %vm577_vm0, %v1556_v49  ;;  %v2197_v49 = vld [vmem:[%s2879_s13 + $0x8] sm:$0xff] }
 0x904   : > { %v1510_v50 = vpop.f32.mrf.mxu2  ;;  %1729 = vmatpush.bf16.msrb.mxu2 %v2197_v49  ;;  %1843 = vmatpush.bf16.msra.mxu1 %v2197_v49 }
 0x913   : > { %2168 = vmatmul.msk.bf16.vlgmr.msra.gmra.mxu0 %vm577_vm0, %v2561_v5 }
 0x963   : > { %v1751_v11 = vpop.f32.mrf.mxu3 }
 0x96b   : > { %v1753_v53 = vpop.f32.mrf.mxu3 }
 0x980   : > { %v1581_v4 = vpop.f32.mrf.mxu0 }
 0x981   : > { %v1607_v30 = vadd.f32 %v1606_v51, %v1581_v4 }
 0x983   : > { %v1613_v38 = vadd.f32 %v2256_v28, %v1607_v30 }
 0x985   : > { %v1615_v54 = vsel %vm1614_vm3, %v1613_v38, 0.0 }
 0x986   : > { %1616 = vadd.xlane.f32.xlu0 %v1615_v54 }
 0x988   : > { %v1583_v55 = vpop.f32.mrf.mxu0 }
 0x990   : > { %v1764_v56 = vpop.f32.mrf.mxu0 }
 0x991   : > { %v1765_v57 = vadd.f32 %v1764_v56, %v1751_v11  ;;  %v2196_v11 = vld [vmem:[%s2879_s13] sm:$0xff] }
 0x992   : > { %1730 = vmatpush.bf16.msrb.mxu2 %v2196_v11  ;;  %1844 = vmatpush.bf16.msra.mxu1 %v2196_v11 }
 0x993   : > { %v1768_v58 = vadd.f32 %v2256_v28, %v1765_v57 }
 0x995   : > { %v1769_v5 = vsel %vm1614_vm3, %v1768_v58, 0.0 }
 0x996   : > { %1770 = vadd.xlane.f32.xlu2 %v1769_v5 }
 0x998   : > { %v1766_v59 = vpop.f32.mrf.mxu0 }
 0x9f9   : > { %v1617_v3 = vpop.xlane.xlu0 %1616 }
 0x9fa   : > { %v1625_v6 = vmul.f32 %v1624_v2, %v1617_v3 }
 0x9fc   : > { %v1626_v7 = vsub.f32 %v1613_v38, %v1625_v6 }
 0x9fe   : > { %v1627_v8 = vmul.f32 %v1626_v7, %v1626_v7 }
 0xa00   : > { %v1628_v9 = vsel %vm1614_vm3, %v1627_v8, 0.0 }
 0xa01   : > { %1629 = vadd.xlane.f32.xlu2 %v1628_v9 }
 0xa09   : > { %v1771_v10 = vpop.xlane.xlu2 %1770 }
 0xa0a   : > { %v1772_v12 = vmul.f32 %v1771_v10, %v1624_v2 }
 0xa0c   : > { %v1773_v13 = vsub.f32 %v1768_v58, %v1772_v12 }
 0xa0e   : > { %v1774_v14 = vmul.f32 %v1773_v13, %v1773_v13 }
 0xa10   : > { %v1775_v15 = vsel %vm1614_vm3, %v1774_v14, 0.0 }
 0xa11   : > { %1776 = vadd.xlane.f32.xlu2 %v1775_v15 }
 0xa74   : > { %v1630_v16 = vpop.xlane.xlu2 %1629 }
 0xa75   : > { %v1631_v17 = vmul.f32 %v1630_v16, %v1624_v2 }
 0xa77   : > { %v1632_v18 = vadd.f32 1e-05, %v1631_v17 }
 0xa79   : > { %2294 = vrsqrt.f32 %v1632_v18  ;;  %vm1639_vm6 = vweird.f32 %v1632_v18 }
 0xa7f   : > { %v2295_v19 = vpop.eup %2294 }
 0xa80   : > { %v1634_v20 = vmul.f32 %v2295_v19, %v1632_v18  ;;  %vm1640_vm5 = vweird.f32 %v2295_v19 }
 0xa81   : > { %vm1641_vm7 = vmor %vm1639_vm6, %vm1640_vm5 }
 0xa82   : > { %v1635_v21 = vmul.f32 %v2295_v19, %v1634_v20 }
 0xa84   : > { %v1636_v22 = vmul.f32 0.5, %v1635_v21  ;;  %v1777_v23 = vpop.xlane.xlu2 %1776 }
 0xa85   : > { %v1778_v24 = vmul.f32 %v1777_v23, %v1624_v2 }
 0xa86   : > { %v1637_v25 = vsub.f32 1.5, %v1636_v22 }
 0xa87   : > { %v1779_v26 = vadd.f32 1e-05, %v1778_v24 }
 0xa88   : > { %v1638_v29 = vmul.f32 %v2295_v19, %v1637_v25 }
 0xa89   : > { %2296 = vrsqrt.f32 %v1779_v26  ;;  %vm1786_vm9 = vweird.f32 %v1779_v26 }
 0xa8a   : > { %v1642_v31 = vsel %vm1641_vm7, %v2295_v19, %v1638_v29 }
 0xa8b   : > { %v1643_v33 = vmul.f32 %v1642_v31, %v1626_v7 }
 0xa8d   : > { %v1647_v34 = vmul.f32 %v2257_v27, %v1643_v33 }
 0xa8f   : > { %v2297_v35 = vpop.eup %2296  ;;  %v2775_v36 = vadd.f32 %v2258_v32, %v1647_v34  ;;  %v2405_v34 = vmov -1.0  }
 0xa90   : > { %v1781_v37 = vmul.f32 %v2297_v35, %v1779_v26  ;;  %vm1787_vm8 = vweird.f32 %v2297_v35 }
 0xa91   : > { %v2778_v39 = vmul.f32 0.70710677, %v2775_v36  ;;  %vm1788_vm10 = vmor %vm1786_vm9, %vm1787_vm8 }
 0xa92   : > { %v1782_v40 = vmul.f32 %v2297_v35, %v1781_v37 }
 0xa93   : > { %v1656_v43 = vand.u32 2147483647, %v2778_v39  ;;  %vm1654_vm5 = vcmp.ge.f32.partialorder %v2778_v39, 0.0 }
 0xa94   : > { %v1783_v44 = vmul.f32 0.5, %v1782_v40 }
 0xa95   : > { %v1657_v46 = vmul.f32 0.3275911, %v1656_v43  ;;  %v1683_v62 = vsub.f32 0.0, %v1656_v43 }
 0xa96   : > { %v1784_v42 = vsub.f32 1.5, %v1783_v44 }
 0xa97   : > { %v1658_v47 = vadd.f32 1.0, %v1657_v46  ;;  %v1684_v2 = vmul.f32 %v1683_v62, %v1656_v43  ;;  %v1652_v43 = vmul.f32 0.5, %v2775_v36 }
 0xa98   : > { %v1785_v48 = vmul.f32 %v2297_v35, %v1784_v42 }
 0xa99   : > { %2298 = vrcp.f32 %v1658_v47  ;;  %v1670_v55 = vand.u32 2147483648, %v1658_v47  ;;  %v1668_v57 = vand.u32 2147483647, %v1658_v47  ;;  %vm1664_vm12 = vweird.f32 %v1658_v47 }
 0xa9a   : > { %v1789_v50 = vsel %vm1788_vm10, %v2297_v35, %v1785_v48  ;;  %v1685_v9 = vmul.f32 1.442695, %v1684_v2  ;;  %v1655_v35 = vsel %vm1654_vm5, 1.0, %v2405_v34 }
 0xa9b   : > { %v1790_v51 = vmul.f32 %v1789_v50, %v1773_v13  ;;  %v1671_v60 = vor.u32 1.1754944e-38, %v1670_v55  ;;  %vm1669_vm14 = vcmp.eq.f32.partialorder %v1668_v57, 8.507059e+37 }
 0xa9d   : > { %v1791_v52 = vmul.f32 %v2257_v27, %v1790_v51 }
 0xa9f   : > { %v2299_v53 = vpop.eup %2298  ;;  %v2793_v28 = vadd.f32 %v2258_v32, %v1791_v52 }
 0xaa0   : > { %v1660_v4 = vmul.f32 %v2299_v53, %v1658_v47  ;;  %vm1665_vm11 = vweird.f32 %v2299_v53 }
 0xaa1   : > { %v2796_v30 = vmul.f32 0.70710677, %v2793_v28  ;;  %vm1666_vm13 = vmor %vm1664_vm12, %vm1665_vm11 }
 0xaa2   : > { %v1661_v38 = vsub.f32 1.0, %v1660_v4 }
 0xaa3   : > { %v1797_v54 = vand.u32 2147483647, %v2796_v30  ;;  %vm1795_vm6 = vcmp.ge.f32.partialorder %v2796_v30, 0.0  ;;  %v2259_v30 = vld [vmem:[%s2880_s14] ss:$0 sm:$0xff] }
 0xaa4   : > { %v1662_v56 = vmul.f32 %v2299_v53, %v1661_v38  ;;  %v1796_v36 = vsel %vm1795_vm6, 1.0, %v2405_v34 }
 0xaa5   : > { %v1798_v58 = vmul.f32 0.3275911, %v1797_v54  ;;  %v1824_v22 = vsub.f32 0.0, %v1797_v54 }
 0xaa6   : > { %v1663_v5 = vadd.f32 %v2299_v53, %v1662_v56  ;;  %v2306_v56 = vld [vmem:[%s2550_s17] sm:$0xff] }
 0xaa7   : > { %v1799_v59 = vadd.f32 1.0, %v1798_v58  ;;  %v1825_v31 = vmul.f32 %v1824_v22, %v1797_v54 }
 0xaa8   : > { %v1667_v61 = vsel %vm1666_vm13, %v2299_v53, %v1663_v5  ;;  %v1793_v53 = vmul.f32 0.5, %v2793_v28 }
 0xaa9   : > { %2300 = vrcp.f32 %v1799_v59  ;;  %v1672_v63 = vsel %vm1669_vm14, %v1671_v60, %v1667_v61  ;;  %v1811_v13 = vand.u32 2147483648, %v1799_v59  ;;  %v1809_v16 = vand.u32 2147483647, %v1799_v59 }
 0xaaa   : > { %v1674_v0 = vmul.f32 1.0614054, %v1672_v63  ;;  %2302 = vpow2.f32 %v1685_v9  ;;  %vm1805_vm1 = vweird.f32 %v1799_v59  ;;  %v1826_v41 = vmul.f32 1.442695, %v1825_v31 }
 0xaab   : > { %v1812_v19 = vor.u32 1.1754944e-38, %v1811_v13  ;;  %vm1810_vm4 = vcmp.eq.f32.partialorder %v1809_v16, 8.507059e+37 }
 0xaac   : > { %v1675_v1 = vadd.f32 -1.4531521, %v1674_v0  ;;  %2304 = vpow2.f32 %v1826_v41 }
 0xaae   : > { %v1676_v3 = vmul.f32 %v1675_v1, %v1672_v63 }
 0xaaf   : > { %v2301_v6 = vpop.eup %2300 }
 0xab0   : > { %v1801_v7 = vmul.f32 %v2301_v6, %v1799_v59  ;;  %v1677_v8 = vadd.f32 1.4214138, %v1676_v3  ;;  %vm1806_vm15 = vweird.f32 %v2301_v6  ;;  %v2303_v26 = vpop.eup %2302 }
 0xab1   : > { %vm1807_vm2 = vmor %vm1805_vm1, %vm1806_vm15 }
 0xab2   : > { %v1802_v10 = vsub.f32 1.0, %v1801_v7  ;;  %v1678_v12 = vmul.f32 %v1677_v8, %v1672_v63  ;;  %v2305_v50 = vpop.eup %2304 }
 0xab4   : > { %v1679_v14 = vadd.f32 -0.28449672, %v1678_v12  ;;  %v1803_v15 = vmul.f32 %v2301_v6, %v1802_v10 }
 0xab6   : > { %v1680_v17 = vmul.f32 %v1679_v14, %v1672_v63  ;;  %v1804_v18 = vadd.f32 %v2301_v6, %v1803_v15 }
 0xab8   : > { %v1681_v20 = vadd.f32 0.2548296, %v1680_v17  ;;  %v1808_v21 = vsel %vm1807_vm2, %v2301_v6, %v1804_v18 }
 0xab9   : > { %v1813_v23 = vsel %vm1810_vm4, %v1812_v19, %v1808_v21 }
 0xaba   : > { %v1682_v24 = vmul.f32 %v1681_v20, %v1672_v63  ;;  %v1815_v25 = vmul.f32 1.0614054, %v1813_v23 }
 0xabc   : > { %v1687_v29 = vmul.f32 %v2303_v26, %v1682_v24  ;;  %v1816_v27 = vadd.f32 -1.4531521, %v1815_v25 }
 0xabe   : > { %v1688_v32 = vsub.f32 1.0, %v1687_v29  ;;  %v1817_v33 = vmul.f32 %v1816_v27, %v1813_v23 }
 0xac0   : > { %v1689_v37 = vmul.f32 %v1688_v32, %v1655_v35  ;;  %v1818_v40 = vadd.f32 1.4214138, %v1817_v33 }
 0xac2   : > { %v1690_v44 = vadd.f32 1.0, %v1689_v37  ;;  %v1819_v45 = vmul.f32 %v1818_v40, %v1813_v23 }
 0xac4   : > { %v1691_v46 = vmul.f32 %v1690_v44, %v1652_v43  ;;  %v1820_v42 = vadd.f32 -0.28449672, %v1819_v45 }
 0xac6   : > { %v1692_v47 = vpack.c.bf16 %v1691_v46, %v1691_v46  ;;  %v1821_v39 = vmul.f32 %v1820_v42, %v1813_v23 }
 0xac8   : > { %2166 = vmatmul.msk.bf16.vlgmr.msrb.gmra.mxu2 %vm1614_vm3, %v1692_v47  ;;  %v1822_v48 = vadd.f32 0.2548296, %v1821_v39 }
 0xaca   : > { %v1823_v49 = vmul.f32 %v1822_v48, %v1813_v23 }
 0xacc   : > { %v1828_v51 = vmul.f32 %v2305_v50, %v1823_v49 }
 0xace   : > { %v1829_v11 = vsub.f32 1.0, %v1828_v51 }
 0xad0   : > { %v1830_v52 = vmul.f32 %v1829_v11, %v1796_v36 }
 0xad2   : > { %v1831_v4 = vadd.f32 1.0, %v1830_v52 }
 0xad4   : > { %v1832_v38 = vmul.f32 %v1831_v4, %v1793_v53 }
 0xad6   : > { %v1833_v54 = vpack.c.bf16 %v1832_v38, %v1832_v38 }
 0xad8   : > { %2169 = vmatmul.msk.bf16.vlgmr.msra.gmra.mxu1 %vm1614_vm3, %v1833_v54 }
 0xb4b   : > { %v1732_v28 = vpop.f32.mrf.mxu2 }
 0xb4c   : > { %v1733_v55 = vadd.f32 %v2259_v30, %v1732_v28 }
 0xb4e   : > { %v1736_v57 = vadd.f32 %v2306_v56, %v1733_v55 }
 0xb50   : > { %1737 = vst.msk [vmem:[%s529_s30] sm:$0xff] %vm577_vm0, %v1736_v57 }
 0xb51   : > { %2335 = shalt.err (!%p2332_p3)
}
 0xb52   : > { %2200 = dma.vmem_to_hbm [thread:$0]  (%p2529_p5), %s1871_s19, 128, %s1873_s1, %s1853_s2   ;;  %v2307_v60 = vld [vmem:[%s2555_s18] sm:$0xff] }
 0xb53   : > { %s2908_s17 = sshll.u32 %s2512_s25, 3  ;;  %v1734_v58 = vpop.f32.mrf.mxu2  ;;  %s536_s3 = scalar_lea.vmem [#allocation4], %s1995_s28 }
 0xb54   : > { %s1882_s23 = scalar_lea.hbm %s2882_s16, %s2908_s17  ;;  %s1884_s29 = sshll.u32 %s536_s3, 4  ;;  %s1885_s29 = int_to_ptr.vmem [resolvable:$true] %s1884_s29 }
 0xb55   : > { %v1846_v5 = vpop.f32.mrf.mxu1  ;;  %s1886_s26 = sshll.u32 %s1882_s23, 4  ;;  %s1858_s21 = scalar_lea.sflag [#allocation5], %s2806_s20  ;;  %s1887_s26 = int_to_ptr.hbm [resolvable:$true] %s1886_s26 }
 0xb56   : > { %v1847_v59 = vadd.f32 %v2259_v30, %v1846_v5  ;;  %s2350_s1 = sshra.s32 %s1887_s26, 4  ;;  %s2356_s28 = scalar_lea.hbm %s2882_s16, 16  ;;  %s2351_s1 = int_to_ptr.hbm [resolvable:$true] %s2350_s1 }
 0xb57   : > { %s2352_s2 = scalar_lea.hbm %s2351_s1, 8  ;;  %p2357_p9 = scmp.lt.s32.totalorder %s2351_s1, %s2882_s16 }
 0xb58   : > { %v1850_v61 = vadd.f32 %v2307_v60, %v1847_v59  ;;  %p2353_p4 = scmp.ne.s32.totalorder %s2351_s1, %s2352_s2  ;;  %p2358_p10 = scmp.lt.s32.totalorder %s2356_s28, %s2352_s2 }
 0xb5a   : > { %1851 = vst.msk [vmem:[%s536_s3] sm:$0xff] %vm577_vm0, %v1850_v61  ;;  %p2354_p7 = pnand %p2353_p4, %p2529_p5  ;;  %p2359_p11 = por %p2358_p10, %p2357_p9 }
 0xb5c   : > { %p2355_p8 = pneg %p2354_p7 }
 0xb5e   : > { %p2360_p12 = pnand %p2359_p11, %p2355_p8 }
 0xb60   : > { %2363 = shalt.err (!%p2360_p12)
}
 0xb61   : > { %2201 = dma.vmem_to_hbm [thread:$0]  (%p2529_p5), %s1885_s29, 128, %s1887_s26, %s1858_s21   ;;  %v1848_v62 = vpop.f32.mrf.mxu1 }
 0xb62 PF: > { %s2909_s18 = sld [smem:[#allocation10_spill]] }
 0xb63   : > { %s2910_s20 = sld [smem:[#allocation8_spill]] }
 0xb68   : > { %p2211_p13 = scmp.ge.s32.totalorder %s2909_s18, 2 }
 0xb69   : > { %s1898_s17 = sand.u32 1, %s2910_s20  }
 0xb6a   : > { %p2205_p0 = pnand %p2211_p13, %p2533_p6  ;;  %s1899_s30 = scalar_lea.sflag [#allocation3], %s1898_s17 }
 0xb6c   : > { %p2206_p1 = pneg %p2205_p0 }
 0xb6e   : > { %2381 = dma.done.wait (%p2206_p1), %s1899_s30, 128  }
 0xb6f   : > { %2383 = vsyncadd (%p2206_p1), %s1899_s30, 4294967168  ;;  %s1909_s23 = scalar_lea.sflag [#allocation5], %s1898_s17 }
 0xb70   : > { %2385 = dma.done.wait (%p2206_p1), %s1909_s23, 128  }
 0xb71   : > { %2387 = vsyncadd (%p2206_p1), %s1909_s23, 4294967168  ;;  %s2912_s24 = sld [smem:[#allocation11_spill]]  ;;  %s2915_s21 = smov %s2394_s22 }
 0xb72   : > { %s2913_s0 = sld [smem:[#allocation9_spill]] }
 0xb73   : > { %s2914_s23 = sld [smem:[#allocation12_spill]] }
 0xb77   : > { %p30_p5 = scmp.ge.s32.totalorder %s2912_s24, 4  }
 0xb78   : > { %s2916_s22 = smov %s2913_s0 }
 0xb79   :  { %32 = sbr.rel (!%p30_p5) target bundleno = 11 (0xb), region = 150 }
 0xb7e   :  { %1915 = vsyncpa [#allocation3], 1 }
 0xb7f   :  { %1917 = vsyncpa [#allocation3 + $0x1], 1 }
 0xb80   :  { %1918 = vsyncpa [#allocation5], 1 }
 0xb81   :  { %1920 = vsyncpa [#allocation5 + $0x1], 1 }

</bundles_post_ra>
